<compile_context>
chip_gen: v6e
topology: v6e:2x2x1
jax: 0.10.0
libtpu: 0.0.40
codegen_flags: <defaults>
</compile_context>

<pallas_src>
import jax
import jax.numpy as jnp
from jax import lax
from jax.experimental import pallas as pl
from jax.experimental.pallas import tpu as pltpu


# ------------------------------------------------------------------ fused kernel
def lstm_lm_kernel(x_ref, wih_ref, whh_ref, bias_ref, wfc_ref, bfc_ref,
                   logp_ref, logits_ref,
                   xproj_ref, hs_ref, h_sc, c_sc):
    """One grid step == one block of `block_b` sequences. All state stays in VMEM."""
    block_b, T, _ = x_ref.shape
    H = h_sc.shape[-1]

    # ---- Phase 1: input projection for every timestep of every sequence in the block,
    #      hoisted off the serial critical path (bf16 MXU operands, f32 accumulation).
    #      Stored time-major so the recurrence reads xproj_ref[t] -> contiguous
    #      (block_b, 4H) tile with zero per-step relayout.
    for b in range(block_b):                                   # static unroll
        xp_b = (jnp.dot(x_ref[b], wih_ref[...],
                        preferred_element_type=jnp.float32)
                + bias_ref[...])                               # (T, 4H) f32
        xproj_ref[:, b, :] = xp_b

    # ---- Phase 2: time recurrence. Only h @ W_hh^T stays on the serial path
    #      (bf16 x bf16 -> f32 accumulation; W_hh is never upcast).
    h_sc[...] = jnp.zeros_like(h_sc)                           # fresh zero state per block
    c_sc[...] = jnp.zeros_like(c_sc)

    def step(t, carry):
        xp_t = xproj_ref[t]                                    # (block_b, 4H) f32
        gates = xp_t + jnp.dot(h_sc[...].astype(jnp.bfloat16), whh_ref[...],
                               preferred_element_type=jnp.float32)
        # PyTorch gate order [i, f, g, o]. (For production sizes make H a multiple of
        # 128 so these lane slices are aligned; at H=32 everything is sub-vreg anyway.)
        i_g = jax.nn.sigmoid(gates[:, 0 * H:1 * H])
        f_g = jax.nn.sigmoid(gates[:, 1 * H:2 * H])
        g_g = jnp.tanh(gates[:, 2 * H:3 * H])
        o_g = jax.nn.sigmoid(gates[:, 3 * H:4 * H])
        c_new = f_g * c_sc[...] + i_g * g_g
        h_new = o_g * jnp.tanh(c_new)
        c_sc[...] = c_new
        h_sc[...] = h_new
        hs_ref[t] = h_new                                      # collect hidden states
        return carry

    # Full unroll only for short fixed T; partial unroll for long sequences avoids
    # vreg spills (64 vregs) and long compile times while keeping LLO visibility.
    unroll = True if T <= 16 else 8
    lax.fori_loop(0, T, step, 0, unroll=unroll)

    # ---- Phase 3: FC + log_softmax per sequence of the block (static loop), written
    #      directly in batch-major order. logits emitted in bf16 to halve the duplicated
    #      HBM writeback; log_probas stay f32.
    # TODO(synk): tile over V with an online logsumexp (extra "arbitrary" grid axis)
    #             for production vocab sizes to stay inside v7x's 64 MiB VMEM.
    for b in range(block_b):                                   # static unroll
        hs_b = hs_ref[:, b, :]                                 # (T, H) f32
        logits_b = (jnp.dot(hs_b.astype(jnp.bfloat16), wfc_ref[...],
                            preferred_element_type=jnp.float32)
                    + bfc_ref[...])                            # (T, V) f32
        m = jnp.max(logits_b, axis=-1, keepdims=True)
        shifted = logits_b - m
        lse = jnp.log(jnp.sum(jnp.exp(shifted), axis=-1, keepdims=True))
        logp_ref[pl.ds(b * T, T), :] = shifted - lse           # local rows b*T .. b*T+T-1
        logits_ref[b] = logits_b.astype(logits_ref.dtype)      # bf16 writeback


def lstm_lm_pallas(emb, w_ih_t, w_hh_t, lstm_bias, w_fc_t, b_fc, *, block_b=None):
    B, T, E = emb.shape
    H = w_hh_t.shape[0]
    V = w_fc_t.shape[1]

    if block_b is None:
        # Keep >= 2 grid steps when possible (v7x: one block per TensorCore), but batch
        # as many sequences per step as that allows (bigger M on the MXU). The cap is a
        # VMEM knob; re-derive it against the 64 MiB v7x budget for production sizes.
        block_b = 1 if B <= 1 else min(max(B // 2, 1), 64)
    block_b = min(block_b, B)

    # Pad B to a multiple of block_b; padded rows are sliced off the outputs below.
    n_blocks = -(-B // block_b)
    B_pad = n_blocks * block_b
    if B_pad != B:
        emb = jnp.pad(emb, ((0, B_pad - B), (0, 0), (0, 0)))

    flops = 2 * B_pad * T * (E * 4 * H + H * 4 * H + H * V)
    transcendentals = B_pad * T * (5 * H + V + 1)
    bytes_accessed = (
        emb.size * emb.dtype.itemsize
        + w_ih_t.size * w_ih_t.dtype.itemsize
        + w_hh_t.size * w_hh_t.dtype.itemsize
        + w_fc_t.size * w_fc_t.dtype.itemsize
        + lstm_bias.size * 4 + b_fc.size * 4
        + B_pad * T * V * 4        # log_probas (f32)
        + B_pad * T * V * 2        # logits (bf16)
    )

    logp, logits = pl.pallas_call(
        lstm_lm_kernel,
        out_shape=(
            jax.ShapeDtypeStruct((B_pad * T, V), jnp.float32),   # log_probas (batch-major rows)
            jax.ShapeDtypeStruct((B_pad, T, V), jnp.bfloat16),   # logits (bf16 writeback)
        ),
        grid_spec=pltpu.PrefetchScalarGridSpec(
            num_scalar_prefetch=0,
            grid=(n_blocks,),                                    # one block of sequences per step
            in_specs=[
                pl.BlockSpec((block_b, T, E), lambda b: (b, 0, 0)),   # emb block
                # Grid-invariant weights: constant index_map -> resident, no refetch.
                # TODO(synk): single-buffer these (pipeline_mode=pl.Buffered(1)) to
                #             reclaim the duplicate VMEM copy inside v7x's 64 MiB.
                pl.BlockSpec((E, 4 * H), lambda b: (0, 0)),           # W_ih^T (bf16)
                pl.BlockSpec((H, 4 * H), lambda b: (0, 0)),           # W_hh^T (bf16)
                pl.BlockSpec((1, 4 * H), lambda b: (0, 0)),           # fused LSTM bias (f32)
                pl.BlockSpec((H, V), lambda b: (0, 0)),               # W_fc^T (bf16)
                pl.BlockSpec((1, V), lambda b: (0, 0)),               # fc bias (f32)
            ],
            out_specs=(
                pl.BlockSpec((block_b * T, V), lambda b: (b, 0)),     # logp rows of this block
                pl.BlockSpec((block_b, T, V), lambda b: (b, 0, 0)),   # logits of this block
            ),
            scratch_shapes=[
                pltpu.VMEM((T, block_b, 4 * H), jnp.float32),  # time-major input projection
                pltpu.VMEM((T, block_b, H), jnp.float32),      # time-major hidden states
                pltpu.VMEM((block_b, H), jnp.float32),         # h state for the block
                pltpu.VMEM((block_b, H), jnp.float32),         # c state for the block
            ],
        ),
        compiler_params=pltpu.CompilerParams(
            dimension_semantics=("parallel",),     # sequence blocks shard across v7x's 2 TCs
        ),
        cost_estimate=pl.CostEstimate(
            flops=flops, transcendentals=transcendentals, bytes_accessed=bytes_accessed),
    )(emb, w_ih_t, w_hh_t, lstm_bias, w_fc_t, b_fc)

    if B_pad != B:
        logp = logp.reshape(B_pad, T, V)[:B].reshape(B * T, V)
        logits = logits[:B]
    return logp, logits


# ------------------------------------------------------------------ model wrapper
@jax.jit
def lstm_model_forward(tokens, params):
    emb_table, w_ih_t, w_hh_t, lstm_bias, w_fc_t, b_fc = params
    # Embedding gather stays in XLA (tiny); dropout is identity (eval / p_drop=0).
    # TODO(synk): fuse the gather into the kernel via scalar-prefetched token ids
    #             (pl.Element row gather / in-kernel DMA) to drop the (B,T,E) intermediate.
    emb = jnp.take(emb_table, tokens, axis=0)                  # (B, T, E) bf16
    return lstm_lm_pallas(emb, w_ih_t, w_hh_t, lstm_bias, w_fc_t, b_fc)


# ------------------------------------------------------------------ reference (pure JAX)
def lstm_model_reference(tokens, params):
    """Mirrors the kernel's numerics: bf16 weights / bf16 h at the dots, f32 accumulation."""
    emb_table, w_ih_t, w_hh_t, lstm_bias, w_fc_t, b_fc = params
    B, T = tokens.shape
    V = w_fc_t.shape[1]
    H = w_hh_t.shape[0]

    emb = jnp.take(emb_table, tokens, axis=0)                  # (B, T, E) bf16
    xproj = jnp.dot(emb, w_ih_t, preferred_element_type=jnp.float32) + lstm_bias[0]

    def step(carry, xp_t):                                     # xp_t: (B, 4H) f32
        h, c = carry
        gates = xp_t + jnp.dot(h.astype(jnp.bfloat16), w_hh_t,
                               preferred_element_type=jnp.float32)
        i = jax.nn.sigmoid(gates[:, 0 * H:1 * H])
        f = jax.nn.sigmoid(gates[:, 1 * H:2 * H])
        g = jnp.tanh(gates[:, 2 * H:3 * H])
        o = jax.nn.sigmoid(gates[:, 3 * H:4 * H])
        c = f * c + i * g
        h = o * jnp.tanh(c)
        return (h, c), h

    h0 = jnp.zeros((B, H), jnp.float32)
    (_, _), hs = lax.scan(step, (h0, h0), jnp.transpose(xproj, (1, 0, 2)))
    h_bth = jnp.transpose(hs, (1, 0, 2))                       # (B, T, H) f32
    logits = jnp.dot(h_bth.astype(jnp.bfloat16), w_fc_t,
                     preferred_element_type=jnp.float32) + b_fc[0]
    logp = jax.nn.log_softmax(logits, axis=-1).reshape(-1, V)
    return logp, logits


# ------------------------------------------------------------------ main
if __name__ == "__main__":
    B, T = 4, 8
    num_tokens, emb_size, hidden_size = 64, 16, 32

    key = jax.random.PRNGKey(0)
    k_emb, k_wih, k_whh, k_bih, k_bhh, k_wfc, k_bfc, k_tok = jax.random.split(key, 8)

    s = 1.0 / jnp.sqrt(hidden_size)
    # Weights stored in bf16 (fed to the MXU in bf16, f32 accumulation); biases in f32.
    emb_table = jax.random.normal(k_emb, (num_tokens, emb_size), jnp.float32).astype(jnp.bfloat16)
    w_ih_t = jax.random.uniform(k_wih, (emb_size, 4 * hidden_size), jnp.float32, -s, s).astype(jnp.bfloat16)
    w_hh_t = jax.random.uniform(k_whh, (hidden_size, 4 * hidden_size), jnp.float32, -s, s).astype(jnp.bfloat16)
    b_ih = jax.random.uniform(k_bih, (4 * hidden_size,), jnp.float32, -s, s)
    b_hh = jax.random.uniform(k_bhh, (4 * hidden_size,), jnp.float32, -s, s)
    lstm_bias = (b_ih + b_hh).reshape(1, 4 * hidden_size)      # PyTorch adds b_ih + b_hh

    w_fc_t = jax.random.uniform(k_wfc, (hidden_size, num_tokens), jnp.float32, -s, s).astype(jnp.bfloat16)
    b_fc = jax.random.uniform(k_bfc, (num_tokens,), jnp.float32, -s, s).reshape(1, num_tokens)

    params = (emb_table, w_ih_t, w_hh_t, lstm_bias, w_fc_t, b_fc)
    tokens = jax.random.randint(k_tok, (B, T), 0, num_tokens, jnp.int32)

    log_probas, logits = lstm_model_forward(tokens, params)
    jax.block_until_ready((log_probas, logits))

    ref_logp, ref_logits = lstm_model_reference(tokens, params)
    assert log_probas.shape == (B * T, num_tokens)
    assert logits.shape == (B, T, num_tokens)
    assert jnp.allclose(log_probas, ref_logp, rtol=2e-2, atol=2e-2)
    assert jnp.allclose(logits.astype(jnp.float32), ref_logits, rtol=2e-2, atol=2e-2)

    print("KERNEL_OK")
</pallas_src>

<mosaic_0001>
module attributes {stable_mosaic.version = 11 : i64} {
  func.func @lstm_lm_kernel(%arg0: i32, %arg1: memref<2x8x16xbf16, #tpu.memory_space<vmem>>, %arg2: memref<16x128xbf16, #tpu.memory_space<vmem>>, %arg3: memref<32x128xbf16, #tpu.memory_space<vmem>>, %arg4: memref<1x128xf32, #tpu.memory_space<vmem>>, %arg5: memref<32x64xbf16, #tpu.memory_space<vmem>>, %arg6: memref<1x64xf32, #tpu.memory_space<vmem>>, %arg7: memref<16x64xf32, #tpu.memory_space<vmem>>, %arg8: memref<2x8x64xbf16, #tpu.memory_space<vmem>>, %arg9: memref<8x2x128xf32, #tpu.memory_space<vmem>>, %arg10: memref<8x2x32xf32, #tpu.memory_space<vmem>>, %arg11: memref<2x32xf32, #tpu.memory_space<vmem>>, %arg12: memref<2x32xf32, #tpu.memory_space<vmem>>) attributes {dimension_semantics = [#tpu.dimension_semantics<parallel>], iteration_bounds = array<i64: 2>, scalar_prefetch = 0 : i64, scratch_operands = 4 : i64, tpu.core_type = #tpu.core_type<tc>, window_params = [{transform_indices = @transform_0, window_bounds = array<i64: 2, 8, 16>}, {pipeline_mode = #tpu.pipeline_mode<synchronous>, transform_indices = @transform_1, window_bounds = array<i64: 16, 128>}, {pipeline_mode = #tpu.pipeline_mode<synchronous>, transform_indices = @transform_2, window_bounds = array<i64: 32, 128>}, {pipeline_mode = #tpu.pipeline_mode<synchronous>, transform_indices = @transform_3, window_bounds = array<i64: 1, 128>}, {pipeline_mode = #tpu.pipeline_mode<synchronous>, transform_indices = @transform_4, window_bounds = array<i64: 32, 64>}, {pipeline_mode = #tpu.pipeline_mode<synchronous>, transform_indices = @transform_5, window_bounds = array<i64: 1, 64>}, {transform_indices = @transform_6, window_bounds = array<i64: 16, 64>}, {transform_indices = @transform_7, window_bounds = array<i64: 2, 8, 64>}]} {
    %c0 = arith.constant 0 : index
    %c0_0 = arith.constant 0 : index
    %c0_1 = arith.constant 0 : index
    %0 = vector.load %arg1[%c0, %c0_0, %c0_1] : memref<2x8x16xbf16, #tpu.memory_space<vmem>>, vector<1x8x16xbf16>
    %1 = vector.shape_cast %0 : vector<1x8x16xbf16> to vector<8x16xbf16>
    %c0_2 = arith.constant 0 : index
    %c0_3 = arith.constant 0 : index
    %2 = vector.load %arg2[%c0_2, %c0_3] : memref<16x128xbf16, #tpu.memory_space<vmem>>, vector<16x128xbf16>
    %cst = arith.constant dense<0.000000e+00> : vector<8x128xf32>
    %3 = tpu.matmul %1, %2, %cst {dimension_numbers = #tpu.dot_dimension_numbers<[1], [0], [0], [1], [0, 0, 1, 1], [], []>} : vector<8x16xbf16>, vector<16x128xbf16>, vector<8x128xf32> -> vector<8x128xf32>
    %c0_4 = arith.constant 0 : index
    %c0_5 = arith.constant 0 : index
    %4 = vector.load %arg4[%c0_4, %c0_5] : memref<1x128xf32, #tpu.memory_space<vmem>>, vector<1x128xf32>
    %5 = vector.broadcast %4 : vector<1x128xf32> to vector<8x128xf32>
    %6 = arith.addf %3, %5 : vector<8x128xf32>
    %c0_6 = arith.constant 0 : index
    %c0_7 = arith.constant 0 : index
    %c0_8 = arith.constant 0 : index
    %7 = vector.load %arg9[%c0_6, %c0_7, %c0_8] : memref<8x2x128xf32, #tpu.memory_space<vmem>>, vector<8x1x128xf32>
    %8 = vector.shape_cast %7 : vector<8x1x128xf32> to vector<8x128xf32>
    %9 = vector.shape_cast %6 : vector<8x128xf32> to vector<8x1x128xf32>
    tpu.vector_store %arg9[%c0_6, %c0_7, %c0_8], %9 {strides = array<i32>} : memref<8x2x128xf32, #tpu.memory_space<vmem>>, vector<8x1x128xf32>,
    %c1 = arith.constant 1 : index
    %c0_9 = arith.constant 0 : index
    %c0_10 = arith.constant 0 : index
    %10 = vector.load %arg1[%c1, %c0_9, %c0_10] : memref<2x8x16xbf16, #tpu.memory_space<vmem>>, vector<1x8x16xbf16>
    %11 = vector.shape_cast %10 : vector<1x8x16xbf16> to vector<8x16xbf16>
    %c0_11 = arith.constant 0 : index
    %c0_12 = arith.constant 0 : index
    %12 = vector.load %arg2[%c0_11, %c0_12] : memref<16x128xbf16, #tpu.memory_space<vmem>>, vector<16x128xbf16>
    %cst_13 = arith.constant dense<0.000000e+00> : vector<8x128xf32>
    %13 = tpu.matmul %11, %12, %cst_13 {dimension_numbers = #tpu.dot_dimension_numbers<[1], [0], [0], [1], [0, 0, 1, 1], [], []>} : vector<8x16xbf16>, vector<16x128xbf16>, vector<8x128xf32> -> vector<8x128xf32>
    %c0_14 = arith.constant 0 : index
    %c0_15 = arith.constant 0 : index
    %14 = vector.load %arg4[%c0_14, %c0_15] : memref<1x128xf32, #tpu.memory_space<vmem>>, vector<1x128xf32>
    %15 = vector.broadcast %14 : vector<1x128xf32> to vector<8x128xf32>
    %16 = arith.addf %13, %15 : vector<8x128xf32>
    %c0_16 = arith.constant 0 : index
    %c1_17 = arith.constant 1 : index
    %c0_18 = arith.constant 0 : index
    %17 = vector.load %arg9[%c0_16, %c1_17, %c0_18] : memref<8x2x128xf32, #tpu.memory_space<vmem>>, vector<8x1x128xf32>
    %18 = vector.shape_cast %17 : vector<8x1x128xf32> to vector<8x128xf32>
    %19 = vector.shape_cast %16 : vector<8x128xf32> to vector<8x1x128xf32>
    tpu.vector_store %arg9[%c0_16, %c1_17, %c0_18], %19 {strides = array<i32>} : memref<8x2x128xf32, #tpu.memory_space<vmem>>, vector<8x1x128xf32>,
    %cst_19 = arith.constant 0.000000e+00 : f32
    %20 = vector.broadcast %cst_19 : f32 to vector<2x32xf32>
    %c0_20 = arith.constant 0 : index
    %c0_21 = arith.constant 0 : index
    %21 = vector.load %arg11[%c0_20, %c0_21] : memref<2x32xf32, #tpu.memory_space<vmem>>, vector<2x32xf32>
    tpu.vector_store %arg11[%c0_20, %c0_21], %20 {strides = array<i32>} : memref<2x32xf32, #tpu.memory_space<vmem>>, vector<2x32xf32>,
    %cst_22 = arith.constant 0.000000e+00 : f32
    %22 = vector.broadcast %cst_22 : f32 to vector<2x32xf32>
    %c0_23 = arith.constant 0 : index
    %c0_24 = arith.constant 0 : index
    %23 = vector.load %arg12[%c0_23, %c0_24] : memref<2x32xf32, #tpu.memory_space<vmem>>, vector<2x32xf32>
    tpu.vector_store %arg12[%c0_23, %c0_24], %22 {strides = array<i32>} : memref<2x32xf32, #tpu.memory_space<vmem>>, vector<2x32xf32>,
    %c0_i32 = arith.constant 0 : i32
    %24 = arith.index_cast %c0_i32 : i32 to index
    %c0_25 = arith.constant 0 : index
    %c0_26 = arith.constant 0 : index
    %25 = vector.load %arg9[%24, %c0_25, %c0_26] : memref<8x2x128xf32, #tpu.memory_space<vmem>>, vector<1x2x128xf32>
    %26 = vector.shape_cast %25 : vector<1x2x128xf32> to vector<2x128xf32>
    %c0_27 = arith.constant 0 : index
    %c0_28 = arith.constant 0 : index
    %27 = vector.load %arg11[%c0_27, %c0_28] : memref<2x32xf32, #tpu.memory_space<vmem>>, vector<2x32xf32>
    %28 = arith.truncf %27 : vector<2x32xf32> to vector<2x32xbf16>
    %c0_29 = arith.constant 0 : index
    %c0_30 = arith.constant 0 : index
    %29 = vector.load %arg3[%c0_29, %c0_30] : memref<32x128xbf16, #tpu.memory_space<vmem>>, vector<32x128xbf16>
    %cst_31 = arith.constant dense<0.000000e+00> : vector<2x128xf32>
    %30 = tpu.matmul %28, %29, %cst_31 {dimension_numbers = #tpu.dot_dimension_numbers<[1], [0], [0], [1], [0, 0, 1, 1], [], []>} : vector<2x32xbf16>, vector<32x128xbf16>, vector<2x128xf32> -> vector<2x128xf32>
    %31 = arith.addf %26, %30 : vector<2x128xf32>
    %32 = vector.extract_strided_slice %31 {offsets = [0, 0], sizes = [2, 32], strides = [1, 1]} : vector<2x128xf32> to vector<2x32xf32>
    %33 = arith.negf %32 : vector<2x32xf32>
    %34 = math.exp %33 : vector<2x32xf32>
    %cst_32 = arith.constant 1.000000e+00 : f32
    %35 = vector.broadcast %cst_32 : f32 to vector<2x32xf32>
    %36 = arith.addf %35, %34 : vector<2x32xf32>
    %37 = arith.divf %35, %36 : vector<2x32xf32>
    %38 = vector.extract_strided_slice %31 {offsets = [0, 32], sizes = [2, 32], strides = [1, 1]} : vector<2x128xf32> to vector<2x32xf32>
    %39 = arith.negf %38 : vector<2x32xf32>
    %40 = math.exp %39 : vector<2x32xf32>
    %cst_33 = arith.constant 1.000000e+00 : f32
    %41 = vector.broadcast %cst_33 : f32 to vector<2x32xf32>
    %42 = arith.addf %41, %40 : vector<2x32xf32>
    %43 = arith.divf %41, %42 : vector<2x32xf32>
    %44 = vector.extract_strided_slice %31 {offsets = [0, 64], sizes = [2, 32], strides = [1, 1]} : vector<2x128xf32> to vector<2x32xf32>
    %45 = math.tanh %44 : vector<2x32xf32>
    %46 = vector.extract_strided_slice %31 {offsets = [0, 96], sizes = [2, 32], strides = [1, 1]} : vector<2x128xf32> to vector<2x32xf32>
    %47 = arith.negf %46 : vector<2x32xf32>
    %48 = math.exp %47 : vector<2x32xf32>
    %cst_34 = arith.constant 1.000000e+00 : f32
    %49 = vector.broadcast %cst_34 : f32 to vector<2x32xf32>
    %50 = arith.addf %49, %48 : vector<2x32xf32>
    %51 = arith.divf %49, %50 : vector<2x32xf32>
    %c0_35 = arith.constant 0 : index
    %c0_36 = arith.constant 0 : index
    %52 = vector.load %arg12[%c0_35, %c0_36] : memref<2x32xf32, #tpu.memory_space<vmem>>, vector<2x32xf32>
    %53 = arith.mulf %43, %52 : vector<2x32xf32>
    %54 = arith.mulf %37, %45 : vector<2x32xf32>
    %55 = arith.addf %53, %54 : vector<2x32xf32>
    %56 = math.tanh %55 : vector<2x32xf32>
    %57 = arith.mulf %51, %56 : vector<2x32xf32>
    %c0_37 = arith.constant 0 : index
    %c0_38 = arith.constant 0 : index
    %58 = vector.load %arg12[%c0_37, %c0_38] : memref<2x32xf32, #tpu.memory_space<vmem>>, vector<2x32xf32>
    tpu.vector_store %arg12[%c0_37, %c0_38], %55 {strides = array<i32>} : memref<2x32xf32, #tpu.memory_space<vmem>>, vector<2x32xf32>,
    %c0_39 = arith.constant 0 : index
    %c0_40 = arith.constant 0 : index
    %59 = vector.load %arg11[%c0_39, %c0_40] : memref<2x32xf32, #tpu.memory_space<vmem>>, vector<2x32xf32>
    tpu.vector_store %arg11[%c0_39, %c0_40], %57 {strides = array<i32>} : memref<2x32xf32, #tpu.memory_space<vmem>>, vector<2x32xf32>,
    %60 = arith.index_cast %c0_i32 : i32 to index
    %c0_41 = arith.constant 0 : index
    %c0_42 = arith.constant 0 : index
    %61 = vector.load %arg10[%60, %c0_41, %c0_42] : memref<8x2x32xf32, #tpu.memory_space<vmem>>, vector<1x2x32xf32>
    %62 = vector.shape_cast %61 : vector<1x2x32xf32> to vector<2x32xf32>
    %63 = vector.shape_cast %57 : vector<2x32xf32> to vector<1x2x32xf32>
    tpu.vector_store %arg10[%60, %c0_41, %c0_42], %63 {strides = array<i32>} : memref<8x2x32xf32, #tpu.memory_space<vmem>>, vector<1x2x32xf32>,
    %c1_i32 = arith.constant 1 : i32
    %64 = arith.index_cast %c1_i32 : i32 to index
    %c0_43 = arith.constant 0 : index
    %c0_44 = arith.constant 0 : index
    %65 = vector.load %arg9[%64, %c0_43, %c0_44] : memref<8x2x128xf32, #tpu.memory_space<vmem>>, vector<1x2x128xf32>
    %66 = vector.shape_cast %65 : vector<1x2x128xf32> to vector<2x128xf32>
    %c0_45 = arith.constant 0 : index
    %c0_46 = arith.constant 0 : index
    %67 = vector.load %arg11[%c0_45, %c0_46] : memref<2x32xf32, #tpu.memory_space<vmem>>, vector<2x32xf32>
    %68 = arith.truncf %67 : vector<2x32xf32> to vector<2x32xbf16>
    %c0_47 = arith.constant 0 : index
    %c0_48 = arith.constant 0 : index
    %69 = vector.load %arg3[%c0_47, %c0_48] : memref<32x128xbf16, #tpu.memory_space<vmem>>, vector<32x128xbf16>
    %cst_49 = arith.constant dense<0.000000e+00> : vector<2x128xf32>
    %70 = tpu.matmul %68, %69, %cst_49 {dimension_numbers = #tpu.dot_dimension_numbers<[1], [0], [0], [1], [0, 0, 1, 1], [], []>} : vector<2x32xbf16>, vector<32x128xbf16>, vector<2x128xf32> -> vector<2x128xf32>
    %71 = arith.addf %66, %70 : vector<2x128xf32>
    %72 = vector.extract_strided_slice %71 {offsets = [0, 0], sizes = [2, 32], strides = [1, 1]} : vector<2x128xf32> to vector<2x32xf32>
    %73 = arith.negf %72 : vector<2x32xf32>
    %74 = math.exp %73 : vector<2x32xf32>
    %cst_50 = arith.constant 1.000000e+00 : f32
    %75 = vector.broadcast %cst_50 : f32 to vector<2x32xf32>
    %76 = arith.addf %75, %74 : vector<2x32xf32>
    %77 = arith.divf %75, %76 : vector<2x32xf32>
    %78 = vector.extract_strided_slice %71 {offsets = [0, 32], sizes = [2, 32], strides = [1, 1]} : vector<2x128xf32> to vector<2x32xf32>
    %79 = arith.negf %78 : vector<2x32xf32>
    %80 = math.exp %79 : vector<2x32xf32>
    %cst_51 = arith.constant 1.000000e+00 : f32
    %81 = vector.broadcast %cst_51 : f32 to vector<2x32xf32>
    %82 = arith.addf %81, %80 : vector<2x32xf32>
    %83 = arith.divf %81, %82 : vector<2x32xf32>
    %84 = vector.extract_strided_slice %71 {offsets = [0, 64], sizes = [2, 32], strides = [1, 1]} : vector<2x128xf32> to vector<2x32xf32>
    %85 = math.tanh %84 : vector<2x32xf32>
    %86 = vector.extract_strided_slice %71 {offsets = [0, 96], sizes = [2, 32], strides = [1, 1]} : vector<2x128xf32> to vector<2x32xf32>
    %87 = arith.negf %86 : vector<2x32xf32>
    %88 = math.exp %87 : vector<2x32xf32>
    %cst_52 = arith.constant 1.000000e+00 : f32
    %89 = vector.broadcast %cst_52 : f32 to vector<2x32xf32>
    %90 = arith.addf %89, %88 : vector<2x32xf32>
    %91 = arith.divf %89, %90 : vector<2x32xf32>
    %c0_53 = arith.constant 0 : index
    %c0_54 = arith.constant 0 : index
    %92 = vector.load %arg12[%c0_53, %c0_54] : memref<2x32xf32, #tpu.memory_space<vmem>>, vector<2x32xf32>
    %93 = arith.mulf %83, %92 : vector<2x32xf32>
    %94 = arith.mulf %77, %85 : vector<2x32xf32>
    %95 = arith.addf %93, %94 : vector<2x32xf32>
    %96 = math.tanh %95 : vector<2x32xf32>
    %97 = arith.mulf %91, %96 : vector<2x32xf32>
    %c0_55 = arith.constant 0 : index
    %c0_56 = arith.constant 0 : index
    %98 = vector.load %arg12[%c0_55, %c0_56] : memref<2x32xf32, #tpu.memory_space<vmem>>, vector<2x32xf32>
    tpu.vector_store %arg12[%c0_55, %c0_56], %95 {strides = array<i32>} : memref<2x32xf32, #tpu.memory_space<vmem>>, vector<2x32xf32>,
    %c0_57 = arith.constant 0 : index
    %c0_58 = arith.constant 0 : index
    %99 = vector.load %arg11[%c0_57, %c0_58] : memref<2x32xf32, #tpu.memory_space<vmem>>, vector<2x32xf32>
    tpu.vector_store %arg11[%c0_57, %c0_58], %97 {strides = array<i32>} : memref<2x32xf32, #tpu.memory_space<vmem>>, vector<2x32xf32>,
    %100 = arith.index_cast %c1_i32 : i32 to index
    %c0_59 = arith.constant 0 : index
    %c0_60 = arith.constant 0 : index
    %101 = vector.load %arg10[%100, %c0_59, %c0_60] : memref<8x2x32xf32, #tpu.memory_space<vmem>>, vector<1x2x32xf32>
    %102 = vector.shape_cast %101 : vector<1x2x32xf32> to vector<2x32xf32>
    %103 = vector.shape_cast %97 : vector<2x32xf32> to vector<1x2x32xf32>
    tpu.vector_store %arg10[%100, %c0_59, %c0_60], %103 {strides = array<i32>} : memref<8x2x32xf32, #tpu.memory_space<vmem>>, vector<1x2x32xf32>,
    %c2_i32 = arith.constant 2 : i32
    %104 = arith.index_cast %c2_i32 : i32 to index
    %c0_61 = arith.constant 0 : index
    %c0_62 = arith.constant 0 : index
    %105 = vector.load %arg9[%104, %c0_61, %c0_62] : memref<8x2x128xf32, #tpu.memory_space<vmem>>, vector<1x2x128xf32>
    %106 = vector.shape_cast %105 : vector<1x2x128xf32> to vector<2x128xf32>
    %c0_63 = arith.constant 0 : index
    %c0_64 = arith.constant 0 : index
    %107 = vector.load %arg11[%c0_63, %c0_64] : memref<2x32xf32, #tpu.memory_space<vmem>>, vector<2x32xf32>
    %108 = arith.truncf %107 : vector<2x32xf32> to vector<2x32xbf16>
    %c0_65 = arith.constant 0 : index
    %c0_66 = arith.constant 0 : index
    %109 = vector.load %arg3[%c0_65, %c0_66] : memref<32x128xbf16, #tpu.memory_space<vmem>>, vector<32x128xbf16>
    %cst_67 = arith.constant dense<0.000000e+00> : vector<2x128xf32>
    %110 = tpu.matmul %108, %109, %cst_67 {dimension_numbers = #tpu.dot_dimension_numbers<[1], [0], [0], [1], [0, 0, 1, 1], [], []>} : vector<2x32xbf16>, vector<32x128xbf16>, vector<2x128xf32> -> vector<2x128xf32>
    %111 = arith.addf %106, %110 : vector<2x128xf32>
    %112 = vector.extract_strided_slice %111 {offsets = [0, 0], sizes = [2, 32], strides = [1, 1]} : vector<2x128xf32> to vector<2x32xf32>
    %113 = arith.negf %112 : vector<2x32xf32>
    %114 = math.exp %113 : vector<2x32xf32>
    %cst_68 = arith.constant 1.000000e+00 : f32
    %115 = vector.broadcast %cst_68 : f32 to vector<2x32xf32>
    %116 = arith.addf %115, %114 : vector<2x32xf32>
    %117 = arith.divf %115, %116 : vector<2x32xf32>
    %118 = vector.extract_strided_slice %111 {offsets = [0, 32], sizes = [2, 32], strides = [1, 1]} : vector<2x128xf32> to vector<2x32xf32>
    %119 = arith.negf %118 : vector<2x32xf32>
    %120 = math.exp %119 : vector<2x32xf32>
    %cst_69 = arith.constant 1.000000e+00 : f32
    %121 = vector.broadcast %cst_69 : f32 to vector<2x32xf32>
    %122 = arith.addf %121, %120 : vector<2x32xf32>
    %123 = arith.divf %121, %122 : vector<2x32xf32>
    %124 = vector.extract_strided_slice %111 {offsets = [0, 64], sizes = [2, 32], strides = [1, 1]} : vector<2x128xf32> to vector<2x32xf32>
    %125 = math.tanh %124 : vector<2x32xf32>
    %126 = vector.extract_strided_slice %111 {offsets = [0, 96], sizes = [2, 32], strides = [1, 1]} : vector<2x128xf32> to vector<2x32xf32>
    %127 = arith.negf %126 : vector<2x32xf32>
    %128 = math.exp %127 : vector<2x32xf32>
    %cst_70 = arith.constant 1.000000e+00 : f32
    %129 = vector.broadcast %cst_70 : f32 to vector<2x32xf32>
    %130 = arith.addf %129, %128 : vector<2x32xf32>
    %131 = arith.divf %129, %130 : vector<2x32xf32>
    %c0_71 = arith.constant 0 : index
    %c0_72 = arith.constant 0 : index
    %132 = vector.load %arg12[%c0_71, %c0_72] : memref<2x32xf32, #tpu.memory_space<vmem>>, vector<2x32xf32>
    %133 = arith.mulf %123, %132 : vector<2x32xf32>
    %134 = arith.mulf %117, %125 : vector<2x32xf32>
    %135 = arith.addf %133, %134 : vector<2x32xf32>
    %136 = math.tanh %135 : vector<2x32xf32>
    %137 = arith.mulf %131, %136 : vector<2x32xf32>
    %c0_73 = arith.constant 0 : index
    %c0_74 = arith.constant 0 : index
    %138 = vector.load %arg12[%c0_73, %c0_74] : memref<2x32xf32, #tpu.memory_space<vmem>>, vector<2x32xf32>
    tpu.vector_store %arg12[%c0_73, %c0_74], %135 {strides = array<i32>} : memref<2x32xf32, #tpu.memory_space<vmem>>, vector<2x32xf32>,
    %c0_75 = arith.constant 0 : index
    %c0_76 = arith.constant 0 : index
    %139 = vector.load %arg11[%c0_75, %c0_76] : memref<2x32xf32, #tpu.memory_space<vmem>>, vector<2x32xf32>
    tpu.vector_store %arg11[%c0_75, %c0_76], %137 {strides = array<i32>} : memref<2x32xf32, #tpu.memory_space<vmem>>, vector<2x32xf32>,
    %140 = arith.index_cast %c2_i32 : i32 to index
    %c0_77 = arith.constant 0 : index
    %c0_78 = arith.constant 0 : index
    %141 = vector.load %arg10[%140, %c0_77, %c0_78] : memref<8x2x32xf32, #tpu.memory_space<vmem>>, vector<1x2x32xf32>
    %142 = vector.shape_cast %141 : vector<1x2x32xf32> to vector<2x32xf32>
    %143 = vector.shape_cast %137 : vector<2x32xf32> to vector<1x2x32xf32>
    tpu.vector_store %arg10[%140, %c0_77, %c0_78], %143 {strides = array<i32>} : memref<8x2x32xf32, #tpu.memory_space<vmem>>, vector<1x2x32xf32>,
    %c3_i32 = arith.constant 3 : i32
    %144 = arith.index_cast %c3_i32 : i32 to index
    %c0_79 = arith.constant 0 : index
    %c0_80 = arith.constant 0 : index
    %145 = vector.load %arg9[%144, %c0_79, %c0_80] : memref<8x2x128xf32, #tpu.memory_space<vmem>>, vector<1x2x128xf32>
    %146 = vector.shape_cast %145 : vector<1x2x128xf32> to vector<2x128xf32>
    %c0_81 = arith.constant 0 : index
    %c0_82 = arith.constant 0 : index
    %147 = vector.load %arg11[%c0_81, %c0_82] : memref<2x32xf32, #tpu.memory_space<vmem>>, vector<2x32xf32>
    %148 = arith.truncf %147 : vector<2x32xf32> to vector<2x32xbf16>
    %c0_83 = arith.constant 0 : index
    %c0_84 = arith.constant 0 : index
    %149 = vector.load %arg3[%c0_83, %c0_84] : memref<32x128xbf16, #tpu.memory_space<vmem>>, vector<32x128xbf16>
    %cst_85 = arith.constant dense<0.000000e+00> : vector<2x128xf32>
    %150 = tpu.matmul %148, %149, %cst_85 {dimension_numbers = #tpu.dot_dimension_numbers<[1], [0], [0], [1], [0, 0, 1, 1], [], []>} : vector<2x32xbf16>, vector<32x128xbf16>, vector<2x128xf32> -> vector<2x128xf32>
    %151 = arith.addf %146, %150 : vector<2x128xf32>
    %152 = vector.extract_strided_slice %151 {offsets = [0, 0], sizes = [2, 32], strides = [1, 1]} : vector<2x128xf32> to vector<2x32xf32>
    %153 = arith.negf %152 : vector<2x32xf32>
    %154 = math.exp %153 : vector<2x32xf32>
    %cst_86 = arith.constant 1.000000e+00 : f32
    %155 = vector.broadcast %cst_86 : f32 to vector<2x32xf32>
    %156 = arith.addf %155, %154 : vector<2x32xf32>
    %157 = arith.divf %155, %156 : vector<2x32xf32>
    %158 = vector.extract_strided_slice %151 {offsets = [0, 32], sizes = [2, 32], strides = [1, 1]} : vector<2x128xf32> to vector<2x32xf32>
    %159 = arith.negf %158 : vector<2x32xf32>
    %160 = math.exp %159 : vector<2x32xf32>
    %cst_87 = arith.constant 1.000000e+00 : f32
    %161 = vector.broadcast %cst_87 : f32 to vector<2x32xf32>
    %162 = arith.addf %161, %160 : vector<2x32xf32>
    %163 = arith.divf %161, %162 : vector<2x32xf32>
    %164 = vector.extract_strided_slice %151 {offsets = [0, 64], sizes = [2, 32], strides = [1, 1]} : vector<2x128xf32> to vector<2x32xf32>
    %165 = math.tanh %164 : vector<2x32xf32>
    %166 = vector.extract_strided_slice %151 {offsets = [0, 96], sizes = [2, 32], strides = [1, 1]} : vector<2x128xf32> to vector<2x32xf32>
    %167 = arith.negf %166 : vector<2x32xf32>
    %168 = math.exp %167 : vector<2x32xf32>
    %cst_88 = arith.constant 1.000000e+00 : f32
    %169 = vector.broadcast %cst_88 : f32 to vector<2x32xf32>
    %170 = arith.addf %169, %168 : vector<2x32xf32>
    %171 = arith.divf %169, %170 : vector<2x32xf32>
    %c0_89 = arith.constant 0 : index
    %c0_90 = arith.constant 0 : index
    %172 = vector.load %arg12[%c0_89, %c0_90] : memref<2x32xf32, #tpu.memory_space<vmem>>, vector<2x32xf32>
    %173 = arith.mulf %163, %172 : vector<2x32xf32>
    %174 = arith.mulf %157, %165 : vector<2x32xf32>
    %175 = arith.addf %173, %174 : vector<2x32xf32>
    %176 = math.tanh %175 : vector<2x32xf32>
    %177 = arith.mulf %171, %176 : vector<2x32xf32>
    %c0_91 = arith.constant 0 : index
    %c0_92 = arith.constant 0 : index
    %178 = vector.load %arg12[%c0_91, %c0_92] : memref<2x32xf32, #tpu.memory_space<vmem>>, vector<2x32xf32>
    tpu.vector_store %arg12[%c0_91, %c0_92], %175 {strides = array<i32>} : memref<2x32xf32, #tpu.memory_space<vmem>>, vector<2x32xf32>,
    %c0_93 = arith.constant 0 : index
    %c0_94 = arith.constant 0 : index
    %179 = vector.load %arg11[%c0_93, %c0_94] : memref<2x32xf32, #tpu.memory_space<vmem>>, vector<2x32xf32>
    tpu.vector_store %arg11[%c0_93, %c0_94], %177 {strides = array<i32>} : memref<2x32xf32, #tpu.memory_space<vmem>>, vector<2x32xf32>,
    %180 = arith.index_cast %c3_i32 : i32 to index
    %c0_95 = arith.constant 0 : index
    %c0_96 = arith.constant 0 : index
    %181 = vector.load %arg10[%180, %c0_95, %c0_96] : memref<8x2x32xf32, #tpu.memory_space<vmem>>, vector<1x2x32xf32>
    %182 = vector.shape_cast %181 : vector<1x2x32xf32> to vector<2x32xf32>
    %183 = vector.shape_cast %177 : vector<2x32xf32> to vector<1x2x32xf32>
    tpu.vector_store %arg10[%180, %c0_95, %c0_96], %183 {strides = array<i32>} : memref<8x2x32xf32, #tpu.memory_space<vmem>>, vector<1x2x32xf32>,
    %c4_i32 = arith.constant 4 : i32
    %184 = arith.index_cast %c4_i32 : i32 to index
    %c0_97 = arith.constant 0 : index
    %c0_98 = arith.constant 0 : index
    %185 = vector.load %arg9[%184, %c0_97, %c0_98] : memref<8x2x128xf32, #tpu.memory_space<vmem>>, vector<1x2x128xf32>
    %186 = vector.shape_cast %185 : vector<1x2x128xf32> to vector<2x128xf32>
    %c0_99 = arith.constant 0 : index
    %c0_100 = arith.constant 0 : index
    %187 = vector.load %arg11[%c0_99, %c0_100] : memref<2x32xf32, #tpu.memory_space<vmem>>, vector<2x32xf32>
    %188 = arith.truncf %187 : vector<2x32xf32> to vector<2x32xbf16>
    %c0_101 = arith.constant 0 : index
    %c0_102 = arith.constant 0 : index
    %189 = vector.load %arg3[%c0_101, %c0_102] : memref<32x128xbf16, #tpu.memory_space<vmem>>, vector<32x128xbf16>
    %cst_103 = arith.constant dense<0.000000e+00> : vector<2x128xf32>
    %190 = tpu.matmul %188, %189, %cst_103 {dimension_numbers = #tpu.dot_dimension_numbers<[1], [0], [0], [1], [0, 0, 1, 1], [], []>} : vector<2x32xbf16>, vector<32x128xbf16>, vector<2x128xf32> -> vector<2x128xf32>
    %191 = arith.addf %186, %190 : vector<2x128xf32>
    %192 = vector.extract_strided_slice %191 {offsets = [0, 0], sizes = [2, 32], strides = [1, 1]} : vector<2x128xf32> to vector<2x32xf32>
    %193 = arith.negf %192 : vector<2x32xf32>
    %194 = math.exp %193 : vector<2x32xf32>
    %cst_104 = arith.constant 1.000000e+00 : f32
    %195 = vector.broadcast %cst_104 : f32 to vector<2x32xf32>
    %196 = arith.addf %195, %194 : vector<2x32xf32>
    %197 = arith.divf %195, %196 : vector<2x32xf32>
    %198 = vector.extract_strided_slice %191 {offsets = [0, 32], sizes = [2, 32], strides = [1, 1]} : vector<2x128xf32> to vector<2x32xf32>
    %199 = arith.negf %198 : vector<2x32xf32>
    %200 = math.exp %199 : vector<2x32xf32>
    %cst_105 = arith.constant 1.000000e+00 : f32
    %201 = vector.broadcast %cst_105 : f32 to vector<2x32xf32>
    %202 = arith.addf %201, %200 : vector<2x32xf32>
    %203 = arith.divf %201, %202 : vector<2x32xf32>
    %204 = vector.extract_strided_slice %191 {offsets = [0, 64], sizes = [2, 32], strides = [1, 1]} : vector<2x128xf32> to vector<2x32xf32>
    %205 = math.tanh %204 : vector<2x32xf32>
    %206 = vector.extract_strided_slice %191 {offsets = [0, 96], sizes = [2, 32], strides = [1, 1]} : vector<2x128xf32> to vector<2x32xf32>
    %207 = arith.negf %206 : vector<2x32xf32>
    %208 = math.exp %207 : vector<2x32xf32>
    %cst_106 = arith.constant 1.000000e+00 : f32
    %209 = vector.broadcast %cst_106 : f32 to vector<2x32xf32>
    %210 = arith.addf %209, %208 : vector<2x32xf32>
    %211 = arith.divf %209, %210 : vector<2x32xf32>
    %c0_107 = arith.constant 0 : index
    %c0_108 = arith.constant 0 : index
    %212 = vector.load %arg12[%c0_107, %c0_108] : memref<2x32xf32, #tpu.memory_space<vmem>>, vector<2x32xf32>
    %213 = arith.mulf %203, %212 : vector<2x32xf32>
    %214 = arith.mulf %197, %205 : vector<2x32xf32>
    %215 = arith.addf %213, %214 : vector<2x32xf32>
    %216 = math.tanh %215 : vector<2x32xf32>
    %217 = arith.mulf %211, %216 : vector<2x32xf32>
    %c0_109 = arith.constant 0 : index
    %c0_110 = arith.constant 0 : index
    %218 = vector.load %arg12[%c0_109, %c0_110] : memref<2x32xf32, #tpu.memory_space<vmem>>, vector<2x32xf32>
    tpu.vector_store %arg12[%c0_109, %c0_110], %215 {strides = array<i32>} : memref<2x32xf32, #tpu.memory_space<vmem>>, vector<2x32xf32>,
    %c0_111 = arith.constant 0 : index
    %c0_112 = arith.constant 0 : index
    %219 = vector.load %arg11[%c0_111, %c0_112] : memref<2x32xf32, #tpu.memory_space<vmem>>, vector<2x32xf32>
    tpu.vector_store %arg11[%c0_111, %c0_112], %217 {strides = array<i32>} : memref<2x32xf32, #tpu.memory_space<vmem>>, vector<2x32xf32>,
    %220 = arith.index_cast %c4_i32 : i32 to index
    %c0_113 = arith.constant 0 : index
    %c0_114 = arith.constant 0 : index
    %221 = vector.load %arg10[%220, %c0_113, %c0_114] : memref<8x2x32xf32, #tpu.memory_space<vmem>>, vector<1x2x32xf32>
    %222 = vector.shape_cast %221 : vector<1x2x32xf32> to vector<2x32xf32>
    %223 = vector.shape_cast %217 : vector<2x32xf32> to vector<1x2x32xf32>
    tpu.vector_store %arg10[%220, %c0_113, %c0_114], %223 {strides = array<i32>} : memref<8x2x32xf32, #tpu.memory_space<vmem>>, vector<1x2x32xf32>,
    %c5_i32 = arith.constant 5 : i32
    %224 = arith.index_cast %c5_i32 : i32 to index
    %c0_115 = arith.constant 0 : index
    %c0_116 = arith.constant 0 : index
    %225 = vector.load %arg9[%224, %c0_115, %c0_116] : memref<8x2x128xf32, #tpu.memory_space<vmem>>, vector<1x2x128xf32>
    %226 = vector.shape_cast %225 : vector<1x2x128xf32> to vector<2x128xf32>
    %c0_117 = arith.constant 0 : index
    %c0_118 = arith.constant 0 : index
    %227 = vector.load %arg11[%c0_117, %c0_118] : memref<2x32xf32, #tpu.memory_space<vmem>>, vector<2x32xf32>
    %228 = arith.truncf %227 : vector<2x32xf32> to vector<2x32xbf16>
    %c0_119 = arith.constant 0 : index
    %c0_120 = arith.constant 0 : index
    %229 = vector.load %arg3[%c0_119, %c0_120] : memref<32x128xbf16, #tpu.memory_space<vmem>>, vector<32x128xbf16>
    %cst_121 = arith.constant dense<0.000000e+00> : vector<2x128xf32>
    %230 = tpu.matmul %228, %229, %cst_121 {dimension_numbers = #tpu.dot_dimension_numbers<[1], [0], [0], [1], [0, 0, 1, 1], [], []>} : vector<2x32xbf16>, vector<32x128xbf16>, vector<2x128xf32> -> vector<2x128xf32>
    %231 = arith.addf %226, %230 : vector<2x128xf32>
    %232 = vector.extract_strided_slice %231 {offsets = [0, 0], sizes = [2, 32], strides = [1, 1]} : vector<2x128xf32> to vector<2x32xf32>
    %233 = arith.negf %232 : vector<2x32xf32>
    %234 = math.exp %233 : vector<2x32xf32>
    %cst_122 = arith.constant 1.000000e+00 : f32
    %235 = vector.broadcast %cst_122 : f32 to vector<2x32xf32>
    %236 = arith.addf %235, %234 : vector<2x32xf32>
    %237 = arith.divf %235, %236 : vector<2x32xf32>
    %238 = vector.extract_strided_slice %231 {offsets = [0, 32], sizes = [2, 32], strides = [1, 1]} : vector<2x128xf32> to vector<2x32xf32>
    %239 = arith.negf %238 : vector<2x32xf32>
    %240 = math.exp %239 : vector<2x32xf32>
    %cst_123 = arith.constant 1.000000e+00 : f32
    %241 = vector.broadcast %cst_123 : f32 to vector<2x32xf32>
    %242 = arith.addf %241, %240 : vector<2x32xf32>
    %243 = arith.divf %241, %242 : vector<2x32xf32>
    %244 = vector.extract_strided_slice %231 {offsets = [0, 64], sizes = [2, 32], strides = [1, 1]} : vector<2x128xf32> to vector<2x32xf32>
    %245 = math.tanh %244 : vector<2x32xf32>
    %246 = vector.extract_strided_slice %231 {offsets = [0, 96], sizes = [2, 32], strides = [1, 1]} : vector<2x128xf32> to vector<2x32xf32>
    %247 = arith.negf %246 : vector<2x32xf32>
    %248 = math.exp %247 : vector<2x32xf32>
    %cst_124 = arith.constant 1.000000e+00 : f32
    %249 = vector.broadcast %cst_124 : f32 to vector<2x32xf32>
    %250 = arith.addf %249, %248 : vector<2x32xf32>
    %251 = arith.divf %249, %250 : vector<2x32xf32>
    %c0_125 = arith.constant 0 : index
    %c0_126 = arith.constant 0 : index
    %252 = vector.load %arg12[%c0_125, %c0_126] : memref<2x32xf32, #tpu.memory_space<vmem>>, vector<2x32xf32>
    %253 = arith.mulf %243, %252 : vector<2x32xf32>
    %254 = arith.mulf %237, %245 : vector<2x32xf32>
    %255 = arith.addf %253, %254 : vector<2x32xf32>
    %256 = math.tanh %255 : vector<2x32xf32>
    %257 = arith.mulf %251, %256 : vector<2x32xf32>
    %c0_127 = arith.constant 0 : index
    %c0_128 = arith.constant 0 : index
    %258 = vector.load %arg12[%c0_127, %c0_128] : memref<2x32xf32, #tpu.memory_space<vmem>>, vector<2x32xf32>
    tpu.vector_store %arg12[%c0_127, %c0_128], %255 {strides = array<i32>} : memref<2x32xf32, #tpu.memory_space<vmem>>, vector<2x32xf32>,
    %c0_129 = arith.constant 0 : index
    %c0_130 = arith.constant 0 : index
    %259 = vector.load %arg11[%c0_129, %c0_130] : memref<2x32xf32, #tpu.memory_space<vmem>>, vector<2x32xf32>
    tpu.vector_store %arg11[%c0_129, %c0_130], %257 {strides = array<i32>} : memref<2x32xf32, #tpu.memory_space<vmem>>, vector<2x32xf32>,
    %260 = arith.index_cast %c5_i32 : i32 to index
    %c0_131 = arith.constant 0 : index
    %c0_132 = arith.constant 0 : index
    %261 = vector.load %arg10[%260, %c0_131, %c0_132] : memref<8x2x32xf32, #tpu.memory_space<vmem>>, vector<1x2x32xf32>
    %262 = vector.shape_cast %261 : vector<1x2x32xf32> to vector<2x32xf32>
    %263 = vector.shape_cast %257 : vector<2x32xf32> to vector<1x2x32xf32>
    tpu.vector_store %arg10[%260, %c0_131, %c0_132], %263 {strides = array<i32>} : memref<8x2x32xf32, #tpu.memory_space<vmem>>, vector<1x2x32xf32>,
    %c6_i32 = arith.constant 6 : i32
    %264 = arith.index_cast %c6_i32 : i32 to index
    %c0_133 = arith.constant 0 : index
    %c0_134 = arith.constant 0 : index
    %265 = vector.load %arg9[%264, %c0_133, %c0_134] : memref<8x2x128xf32, #tpu.memory_space<vmem>>, vector<1x2x128xf32>
    %266 = vector.shape_cast %265 : vector<1x2x128xf32> to vector<2x128xf32>
    %c0_135 = arith.constant 0 : index
    %c0_136 = arith.constant 0 : index
    %267 = vector.load %arg11[%c0_135, %c0_136] : memref<2x32xf32, #tpu.memory_space<vmem>>, vector<2x32xf32>
    %268 = arith.truncf %267 : vector<2x32xf32> to vector<2x32xbf16>
    %c0_137 = arith.constant 0 : index
    %c0_138 = arith.constant 0 : index
    %269 = vector.load %arg3[%c0_137, %c0_138] : memref<32x128xbf16, #tpu.memory_space<vmem>>, vector<32x128xbf16>
    %cst_139 = arith.constant dense<0.000000e+00> : vector<2x128xf32>
    %270 = tpu.matmul %268, %269, %cst_139 {dimension_numbers = #tpu.dot_dimension_numbers<[1], [0], [0], [1], [0, 0, 1, 1], [], []>} : vector<2x32xbf16>, vector<32x128xbf16>, vector<2x128xf32> -> vector<2x128xf32>
    %271 = arith.addf %266, %270 : vector<2x128xf32>
    %272 = vector.extract_strided_slice %271 {offsets = [0, 0], sizes = [2, 32], strides = [1, 1]} : vector<2x128xf32> to vector<2x32xf32>
    %273 = arith.negf %272 : vector<2x32xf32>
    %274 = math.exp %273 : vector<2x32xf32>
    %cst_140 = arith.constant 1.000000e+00 : f32
    %275 = vector.broadcast %cst_140 : f32 to vector<2x32xf32>
    %276 = arith.addf %275, %274 : vector<2x32xf32>
    %277 = arith.divf %275, %276 : vector<2x32xf32>
    %278 = vector.extract_strided_slice %271 {offsets = [0, 32], sizes = [2, 32], strides = [1, 1]} : vector<2x128xf32> to vector<2x32xf32>
    %279 = arith.negf %278 : vector<2x32xf32>
    %280 = math.exp %279 : vector<2x32xf32>
    %cst_141 = arith.constant 1.000000e+00 : f32
    %281 = vector.broadcast %cst_141 : f32 to vector<2x32xf32>
    %282 = arith.addf %281, %280 : vector<2x32xf32>
    %283 = arith.divf %281, %282 : vector<2x32xf32>
    %284 = vector.extract_strided_slice %271 {offsets = [0, 64], sizes = [2, 32], strides = [1, 1]} : vector<2x128xf32> to vector<2x32xf32>
    %285 = math.tanh %284 : vector<2x32xf32>
    %286 = vector.extract_strided_slice %271 {offsets = [0, 96], sizes = [2, 32], strides = [1, 1]} : vector<2x128xf32> to vector<2x32xf32>
    %287 = arith.negf %286 : vector<2x32xf32>
    %288 = math.exp %287 : vector<2x32xf32>
    %cst_142 = arith.constant 1.000000e+00 : f32
    %289 = vector.broadcast %cst_142 : f32 to vector<2x32xf32>
    %290 = arith.addf %289, %288 : vector<2x32xf32>
    %291 = arith.divf %289, %290 : vector<2x32xf32>
    %c0_143 = arith.constant 0 : index
    %c0_144 = arith.constant 0 : index
    %292 = vector.load %arg12[%c0_143, %c0_144] : memref<2x32xf32, #tpu.memory_space<vmem>>, vector<2x32xf32>
    %293 = arith.mulf %283, %292 : vector<2x32xf32>
    %294 = arith.mulf %277, %285 : vector<2x32xf32>
    %295 = arith.addf %293, %294 : vector<2x32xf32>
    %296 = math.tanh %295 : vector<2x32xf32>
    %297 = arith.mulf %291, %296 : vector<2x32xf32>
    %c0_145 = arith.constant 0 : index
    %c0_146 = arith.constant 0 : index
    %298 = vector.load %arg12[%c0_145, %c0_146] : memref<2x32xf32, #tpu.memory_space<vmem>>, vector<2x32xf32>
    tpu.vector_store %arg12[%c0_145, %c0_146], %295 {strides = array<i32>} : memref<2x32xf32, #tpu.memory_space<vmem>>, vector<2x32xf32>,
    %c0_147 = arith.constant 0 : index
    %c0_148 = arith.constant 0 : index
    %299 = vector.load %arg11[%c0_147, %c0_148] : memref<2x32xf32, #tpu.memory_space<vmem>>, vector<2x32xf32>
    tpu.vector_store %arg11[%c0_147, %c0_148], %297 {strides = array<i32>} : memref<2x32xf32, #tpu.memory_space<vmem>>, vector<2x32xf32>,
    %300 = arith.index_cast %c6_i32 : i32 to index
    %c0_149 = arith.constant 0 : index
    %c0_150 = arith.constant 0 : index
    %301 = vector.load %arg10[%300, %c0_149, %c0_150] : memref<8x2x32xf32, #tpu.memory_space<vmem>>, vector<1x2x32xf32>
    %302 = vector.shape_cast %301 : vector<1x2x32xf32> to vector<2x32xf32>
    %303 = vector.shape_cast %297 : vector<2x32xf32> to vector<1x2x32xf32>
    tpu.vector_store %arg10[%300, %c0_149, %c0_150], %303 {strides = array<i32>} : memref<8x2x32xf32, #tpu.memory_space<vmem>>, vector<1x2x32xf32>,
    %c7_i32 = arith.constant 7 : i32
    %304 = arith.index_cast %c7_i32 : i32 to index
    %c0_151 = arith.constant 0 : index
    %c0_152 = arith.constant 0 : index
    %305 = vector.load %arg9[%304, %c0_151, %c0_152] : memref<8x2x128xf32, #tpu.memory_space<vmem>>, vector<1x2x128xf32>
    %306 = vector.shape_cast %305 : vector<1x2x128xf32> to vector<2x128xf32>
    %c0_153 = arith.constant 0 : index
    %c0_154 = arith.constant 0 : index
    %307 = vector.load %arg11[%c0_153, %c0_154] : memref<2x32xf32, #tpu.memory_space<vmem>>, vector<2x32xf32>
    %308 = arith.truncf %307 : vector<2x32xf32> to vector<2x32xbf16>
    %c0_155 = arith.constant 0 : index
    %c0_156 = arith.constant 0 : index
    %309 = vector.load %arg3[%c0_155, %c0_156] : memref<32x128xbf16, #tpu.memory_space<vmem>>, vector<32x128xbf16>
    %cst_157 = arith.constant dense<0.000000e+00> : vector<2x128xf32>
    %310 = tpu.matmul %308, %309, %cst_157 {dimension_numbers = #tpu.dot_dimension_numbers<[1], [0], [0], [1], [0, 0, 1, 1], [], []>} : vector<2x32xbf16>, vector<32x128xbf16>, vector<2x128xf32> -> vector<2x128xf32>
    %311 = arith.addf %306, %310 : vector<2x128xf32>
    %312 = vector.extract_strided_slice %311 {offsets = [0, 0], sizes = [2, 32], strides = [1, 1]} : vector<2x128xf32> to vector<2x32xf32>
    %313 = arith.negf %312 : vector<2x32xf32>
    %314 = math.exp %313 : vector<2x32xf32>
    %cst_158 = arith.constant 1.000000e+00 : f32
    %315 = vector.broadcast %cst_158 : f32 to vector<2x32xf32>
    %316 = arith.addf %315, %314 : vector<2x32xf32>
    %317 = arith.divf %315, %316 : vector<2x32xf32>
    %318 = vector.extract_strided_slice %311 {offsets = [0, 32], sizes = [2, 32], strides = [1, 1]} : vector<2x128xf32> to vector<2x32xf32>
    %319 = arith.negf %318 : vector<2x32xf32>
    %320 = math.exp %319 : vector<2x32xf32>
    %cst_159 = arith.constant 1.000000e+00 : f32
    %321 = vector.broadcast %cst_159 : f32 to vector<2x32xf32>
    %322 = arith.addf %321, %320 : vector<2x32xf32>
    %323 = arith.divf %321, %322 : vector<2x32xf32>
    %324 = vector.extract_strided_slice %311 {offsets = [0, 64], sizes = [2, 32], strides = [1, 1]} : vector<2x128xf32> to vector<2x32xf32>
    %325 = math.tanh %324 : vector<2x32xf32>
    %326 = vector.extract_strided_slice %311 {offsets = [0, 96], sizes = [2, 32], strides = [1, 1]} : vector<2x128xf32> to vector<2x32xf32>
    %327 = arith.negf %326 : vector<2x32xf32>
    %328 = math.exp %327 : vector<2x32xf32>
    %cst_160 = arith.constant 1.000000e+00 : f32
    %329 = vector.broadcast %cst_160 : f32 to vector<2x32xf32>
    %330 = arith.addf %329, %328 : vector<2x32xf32>
    %331 = arith.divf %329, %330 : vector<2x32xf32>
    %c0_161 = arith.constant 0 : index
    %c0_162 = arith.constant 0 : index
    %332 = vector.load %arg12[%c0_161, %c0_162] : memref<2x32xf32, #tpu.memory_space<vmem>>, vector<2x32xf32>
    %333 = arith.mulf %323, %332 : vector<2x32xf32>
    %334 = arith.mulf %317, %325 : vector<2x32xf32>
    %335 = arith.addf %333, %334 : vector<2x32xf32>
    %336 = math.tanh %335 : vector<2x32xf32>
    %337 = arith.mulf %331, %336 : vector<2x32xf32>
    %c0_163 = arith.constant 0 : index
    %c0_164 = arith.constant 0 : index
    %338 = vector.load %arg12[%c0_163, %c0_164] : memref<2x32xf32, #tpu.memory_space<vmem>>, vector<2x32xf32>
    tpu.vector_store %arg12[%c0_163, %c0_164], %335 {strides = array<i32>} : memref<2x32xf32, #tpu.memory_space<vmem>>, vector<2x32xf32>,
    %c0_165 = arith.constant 0 : index
    %c0_166 = arith.constant 0 : index
    %339 = vector.load %arg11[%c0_165, %c0_166] : memref<2x32xf32, #tpu.memory_space<vmem>>, vector<2x32xf32>
    tpu.vector_store %arg11[%c0_165, %c0_166], %337 {strides = array<i32>} : memref<2x32xf32, #tpu.memory_space<vmem>>, vector<2x32xf32>,
    %340 = arith.index_cast %c7_i32 : i32 to index
    %c0_167 = arith.constant 0 : index
    %c0_168 = arith.constant 0 : index
    %341 = vector.load %arg10[%340, %c0_167, %c0_168] : memref<8x2x32xf32, #tpu.memory_space<vmem>>, vector<1x2x32xf32>
    %342 = vector.shape_cast %341 : vector<1x2x32xf32> to vector<2x32xf32>
    %343 = vector.shape_cast %337 : vector<2x32xf32> to vector<1x2x32xf32>
    tpu.vector_store %arg10[%340, %c0_167, %c0_168], %343 {strides = array<i32>} : memref<8x2x32xf32, #tpu.memory_space<vmem>>, vector<1x2x32xf32>,
    %c8_i32 = arith.constant 8 : i32
    %c0_169 = arith.constant 0 : index
    %c0_170 = arith.constant 0 : index
    %c0_171 = arith.constant 0 : index
    %344 = vector.load %arg10[%c0_169, %c0_170, %c0_171] : memref<8x2x32xf32, #tpu.memory_space<vmem>>, vector<8x1x32xf32>
    %345 = vector.shape_cast %344 : vector<8x1x32xf32> to vector<8x32xf32>
    %346 = arith.truncf %345 : vector<8x32xf32> to vector<8x32xbf16>
    %c0_172 = arith.constant 0 : index
    %c0_173 = arith.constant 0 : index
    %347 = vector.load %arg5[%c0_172, %c0_173] : memref<32x64xbf16, #tpu.memory_space<vmem>>, vector<32x64xbf16>
    %cst_174 = arith.constant dense<0.000000e+00> : vector<8x64xf32>
    %348 = tpu.matmul %346, %347, %cst_174 {dimension_numbers = #tpu.dot_dimension_numbers<[1], [0], [0], [1], [0, 0, 1, 1], [], []>} : vector<8x32xbf16>, vector<32x64xbf16>, vector<8x64xf32> -> vector<8x64xf32>
    %c0_175 = arith.constant 0 : index
    %c0_176 = arith.constant 0 : index
    %349 = vector.load %arg6[%c0_175, %c0_176] : memref<1x64xf32, #tpu.memory_space<vmem>>, vector<1x64xf32>
    %350 = vector.broadcast %349 : vector<1x64xf32> to vector<8x64xf32>
    %351 = arith.addf %348, %350 : vector<8x64xf32>
    %cst_177 = arith.constant dense<0xFF800000> : vector<8xf32>
    %352 = vector.multi_reduction <maximumf>, %351, %cst_177 [1] : vector<8x64xf32> to vector<8xf32>
    %353 = vector.shape_cast %352 : vector<8xf32> to vector<8x1xf32>
    %354 = vector.broadcast %353 : vector<8x1xf32> to vector<8x64xf32>
    %355 = arith.subf %351, %354 : vector<8x64xf32>
    %356 = math.exp %355 : vector<8x64xf32>
    %cst_178 = arith.constant dense<0.000000e+00> : vector<8xf32>
    %357 = vector.multi_reduction <add>, %356, %cst_178 [1] : vector<8x64xf32> to vector<8xf32>
    %358 = vector.shape_cast %357 : vector<8xf32> to vector<8x1xf32>
    %359 = math.log %358 : vector<8x1xf32>
    %360 = vector.broadcast %359 : vector<8x1xf32> to vector<8x64xf32>
    %361 = arith.subf %355, %360 : vector<8x64xf32>
    %c0_179 = arith.constant 0 : index
    %c0_180 = arith.constant 0 : index
    %362 = vector.load %arg7[%c0_179, %c0_180] : memref<16x64xf32, #tpu.memory_space<vmem>>, vector<8x64xf32>
    tpu.vector_store %arg7[%c0_179, %c0_180], %361 {strides = array<i32>} : memref<16x64xf32, #tpu.memory_space<vmem>>, vector<8x64xf32>,
    %363 = arith.truncf %351 : vector<8x64xf32> to vector<8x64xbf16>
    %c0_181 = arith.constant 0 : index
    %c0_182 = arith.constant 0 : index
    %c0_183 = arith.constant 0 : index
    %364 = vector.load %arg8[%c0_181, %c0_182, %c0_183] : memref<2x8x64xbf16, #tpu.memory_space<vmem>>, vector<1x8x64xbf16>
    %365 = vector.shape_cast %364 : vector<1x8x64xbf16> to vector<8x64xbf16>
    %366 = vector.shape_cast %363 : vector<8x64xbf16> to vector<1x8x64xbf16>
    tpu.vector_store %arg8[%c0_181, %c0_182, %c0_183], %366 {strides = array<i32>} : memref<2x8x64xbf16, #tpu.memory_space<vmem>>, vector<1x8x64xbf16>,
    %c0_184 = arith.constant 0 : index
    %c1_185 = arith.constant 1 : index
    %c0_186 = arith.constant 0 : index
    %367 = vector.load %arg10[%c0_184, %c1_185, %c0_186] : memref<8x2x32xf32, #tpu.memory_space<vmem>>, vector<8x1x32xf32>
    %368 = vector.shape_cast %367 : vector<8x1x32xf32> to vector<8x32xf32>
    %369 = arith.truncf %368 : vector<8x32xf32> to vector<8x32xbf16>
    %c0_187 = arith.constant 0 : index
    %c0_188 = arith.constant 0 : index
    %370 = vector.load %arg5[%c0_187, %c0_188] : memref<32x64xbf16, #tpu.memory_space<vmem>>, vector<32x64xbf16>
    %cst_189 = arith.constant dense<0.000000e+00> : vector<8x64xf32>
    %371 = tpu.matmul %369, %370, %cst_189 {dimension_numbers = #tpu.dot_dimension_numbers<[1], [0], [0], [1], [0, 0, 1, 1], [], []>} : vector<8x32xbf16>, vector<32x64xbf16>, vector<8x64xf32> -> vector<8x64xf32>
    %c0_190 = arith.constant 0 : index
    %c0_191 = arith.constant 0 : index
    %372 = vector.load %arg6[%c0_190, %c0_191] : memref<1x64xf32, #tpu.memory_space<vmem>>, vector<1x64xf32>
    %373 = vector.broadcast %372 : vector<1x64xf32> to vector<8x64xf32>
    %374 = arith.addf %371, %373 : vector<8x64xf32>
    %cst_192 = arith.constant dense<0xFF800000> : vector<8xf32>
    %375 = vector.multi_reduction <maximumf>, %374, %cst_192 [1] : vector<8x64xf32> to vector<8xf32>
    %376 = vector.shape_cast %375 : vector<8xf32> to vector<8x1xf32>
    %377 = vector.broadcast %376 : vector<8x1xf32> to vector<8x64xf32>
    %378 = arith.subf %374, %377 : vector<8x64xf32>
    %379 = math.exp %378 : vector<8x64xf32>
    %cst_193 = arith.constant dense<0.000000e+00> : vector<8xf32>
    %380 = vector.multi_reduction <add>, %379, %cst_193 [1] : vector<8x64xf32> to vector<8xf32>
    %381 = vector.shape_cast %380 : vector<8xf32> to vector<8x1xf32>
    %382 = math.log %381 : vector<8x1xf32>
    %383 = vector.broadcast %382 : vector<8x1xf32> to vector<8x64xf32>
    %384 = arith.subf %378, %383 : vector<8x64xf32>
    %c8 = arith.constant 8 : index
    %c0_194 = arith.constant 0 : index
    %385 = vector.load %arg7[%c8, %c0_194] : memref<16x64xf32, #tpu.memory_space<vmem>>, vector<8x64xf32>
    tpu.vector_store %arg7[%c8, %c0_194], %384 {strides = array<i32>} : memref<16x64xf32, #tpu.memory_space<vmem>>, vector<8x64xf32>,
    %386 = arith.truncf %374 : vector<8x64xf32> to vector<8x64xbf16>
    %c1_195 = arith.constant 1 : index
    %c0_196 = arith.constant 0 : index
    %c0_197 = arith.constant 0 : index
    %387 = vector.load %arg8[%c1_195, %c0_196, %c0_197] : memref<2x8x64xbf16, #tpu.memory_space<vmem>>, vector<1x8x64xbf16>
    %388 = vector.shape_cast %387 : vector<1x8x64xbf16> to vector<8x64xbf16>
    %389 = vector.shape_cast %386 : vector<8x64xbf16> to vector<1x8x64xbf16>
    tpu.vector_store %arg8[%c1_195, %c0_196, %c0_197], %389 {strides = array<i32>} : memref<2x8x64xbf16, #tpu.memory_space<vmem>>, vector<1x8x64xbf16>,
    return
  }
  func.func @transform_0(%arg0: i32) -> (i32, i32, i32) {
    %c0_i32 = arith.constant 0 : i32
    %c0_i32_0 = arith.constant 0 : i32
    %c0_i32_1 = arith.constant 0 : i32
    return %arg0, %c0_i32, %c0_i32_0 : i32, i32, i32
  }
  func.func @transform_1(%arg0: i32) -> (i32, i32) {
    %c0_i32 = arith.constant 0 : i32
    %c0_i32_0 = arith.constant 0 : i32
    %c0_i32_1 = arith.constant 0 : i32
    return %c0_i32, %c0_i32_0 : i32, i32
  }
  func.func @transform_2(%arg0: i32) -> (i32, i32) {
    %c0_i32 = arith.constant 0 : i32
    %c0_i32_0 = arith.constant 0 : i32
    %c0_i32_1 = arith.constant 0 : i32
    return %c0_i32, %c0_i32_0 : i32, i32
  }
  func.func @transform_3(%arg0: i32) -> (i32, i32) {
    %c0_i32 = arith.constant 0 : i32
    %c0_i32_0 = arith.constant 0 : i32
    %c0_i32_1 = arith.constant 0 : i32
    return %c0_i32, %c0_i32_0 : i32, i32
  }
  func.func @transform_4(%arg0: i32) -> (i32, i32) {
    %c0_i32 = arith.constant 0 : i32
    %c0_i32_0 = arith.constant 0 : i32
    %c0_i32_1 = arith.constant 0 : i32
    return %c0_i32, %c0_i32_0 : i32, i32
  }
  func.func @transform_5(%arg0: i32) -> (i32, i32) {
    %c0_i32 = arith.constant 0 : i32
    %c0_i32_0 = arith.constant 0 : i32
    %c0_i32_1 = arith.constant 0 : i32
    return %c0_i32, %c0_i32_0 : i32, i32
  }
  func.func @transform_6(%arg0: i32) -> (i32, i32) {
    %c0_i32 = arith.constant 0 : i32
    %c0_i32_0 = arith.constant 0 : i32
    return %arg0, %c0_i32 : i32, i32
  }
  func.func @transform_7(%arg0: i32) -> (i32, i32, i32) {
    %c0_i32 = arith.constant 0 : i32
    %c0_i32_0 = arith.constant 0 : i32
    %c0_i32_1 = arith.constant 0 : i32
    return %arg0, %c0_i32, %c0_i32_0 : i32, i32, i32
  }
}

</mosaic_0001>

<bundles_post_ra>
// kernel: lstm_model_forward.1
= control target key start
LH: loop header
LB: loop body
LE: loop exit
PB: predicated region body
PF: predicated region fallthrough
CT: control target
= control target key end

     0   :  { %13 = vsyncpa [#allocation7], 0  ;;  %s2630_s0 = inlined_call_operand.vmem [shape: bf16[4,8,16], index: 0, kind: input, shape index: {}]   ;;  %s2631_s1 = inlined_call_operand.vmem [shape: bf16[16,128], index: 1, kind: input, shape index: {}]   ;;  %s2632_s2 = inlined_call_operand.vmem [shape: bf16[32,128], index: 2, kind: input, shape index: {}]   ;;  %s2633_s3 = inlined_call_operand.vmem [shape: f32[1,128], index: 3, kind: input, shape index: {}]   ;;  %s2634_s4 = inlined_call_operand.vmem [shape: bf16[32,64], index: 4, kind: input, shape index: {}]   ;;  %s2635_s5 = inlined_call_operand.vmem [shape: f32[1,64], index: 5, kind: input, shape index: {}]   ;;  %s2636_s6 = inlined_call_operand.hbm [shape: f32[32,64], index: 6, kind: output, shape index: {0}]   ;;  %s2637_s7 = inlined_call_operand.hbm [shape: bf16[4,8,64], index: 7, kind: output, shape index: {1}]  }
   0x1   :  { %15 = vsyncpa [#allocation7 + $0x1], 0 }
   0x2   :  { %16 = vsyncpa [#allocation9], 0 }
   0x3   :  { %18 = vsyncpa [#allocation9 + $0x1], 0  ;;  %s2272_s24 = smov 0   ;;  %s2274_s25 = smov 0  }
   0x4   :  { %s2276_s26 = smov 0   ;;  %s2278_s27 = smov 0  }
   0x5 LB: > { %s2293_s28 = sadd.s32 4294967295, %s2219_s27   ;;  %s1782_s29 = sadd.s32 4294967294, %s2219_s27   ;;  %s2219_s27 = sphi %s2278_s27, %s2643_s27   ;;  %s2215_s26 = sphi %s2276_s26, %s2642_s26   ;;  %s2211_s25 = sphi %s2274_s25, %s2641_s25   ;;  %s2207_s24 = sphi %s2272_s24, %s2640_s24  }
   0x6   : > { %s2297_s30 = sadd.s32 1, %s2219_s27   ;;  %s162_s8 = sadd.s32 1, %s2215_s26 }
   0x7   : > { %s159_s9 = ssub.s32 %s2219_s27, %s2297_s30  ;;  %p172_p0 = scmp.ne.s32.totalorder %s2215_s26, %s2211_s25 }
   0x8   : > { %p160_p1 = scmp.eq.s32.totalorder %s159_s9, 0  ;;  %p173_p2 = scmp.eq.s32.totalorder %s2293_s28, 1 }
   0x9   : > { %p178_p3 = scmp.ne.s32.totalorder %s2211_s25, %s2207_s24  ;;  %p179_p4 = scmp.eq.s32.totalorder %s1782_s29, 1 }
   0xa   : > { %s2308_s10 = scalar_select %p160_p1, %s2215_s26, %s162_s8  }
   0xb   : > { %p2310_p5 = por %p173_p2, %p172_p0  ;;  %p2314_p6 = por %p179_p4, %p178_p3 }
   0xc   : > { %p1785_p7 = scmp.ge.s32.totalorder %s2219_s27, 1  ;;  %p247_p8 = scmp.lt.s32.totalorder %s2219_s27, 3 }
   0xe   : > { %p248_p9 = pnand %p1785_p7, %p247_p8 }
   0xf   : > { %s1788_s17 = sshll.u32 (!%p248_p9), %s2293_s28, 1  ;;  %s2224_s14 = smov (!%p248_p9), 64  }
  0x10   : > { %251 = sbr.rel (%p248_p9) target bundleno = 6162 (0x1812), region = 44  ;;  %p285_p10 = scmp.lt.s32.totalorder (!%p248_p9), %s1788_s17, 3 }
  0x11   : > { %s2225_s15 = smov (!%p248_p9), 32   ;;  %s2226_s16 = smov (!%p248_p9), 96  }
  0x12   : > { %s1855_s29 = sshll.u32 (!%p248_p9), %s2293_s28, 7 }
  0x15   : > { %v2035_v0 = vld [vmem:[%s2631_s1] sm:$0xff]   ;;  %v2221_v1 = vmov 0.0   ;;  %vm2222_vm0 = vmmov 0   ;;  %vm309_vm1 = vcmask 130048   ;;  %vm545_vm2 = vcmask 254976   ;;  %s2645_s17 = smov (!%p285_p10, %s1788_s17), 3 }
  0x16   : > { %1890 = vmatprep.subr.bf16.mxu0 %v2221_v1  ;;  %1896 = vmatprep.subr.bf16.mxu1 %v2221_v1  ;;  %v2036_v2 = vld [vmem:[%s2631_s1] sm:$0xff]   ;;  %v2037_v3 = vld [vmem:[%s2632_s2 + $0x8] sm:$0xff]   ;;  %546 = vst.msk [vmem:[#allocation4] sm:$0x3] %vm545_vm2, %v2221_v1  ;;  %547 = vst.msk [vmem:[#allocation5] sm:$0x3] %vm545_vm2, %v2221_v1  ;;  %v358_v11 = vlaneseq }
  0x17   : > { %1891 = vmatpush3.bf16.msra.mxu0 %v2035_v0  ;;  %1892 = vmatprep.mubr.msk.bf16.mxu0 %vm2222_vm0, %v2221_v1  ;;  %s1789_s20 = sshll.u32 %s2645_s17, 2  ;;  %vm567_vm3 = vcmask 261120   ;;  %v2038_v6 = vld [vmem:[%s2632_s2] sm:$0xff]   ;;  %v2223_v9 = vmov 1966171168   ;;  %vm1431_vm4 = vcmask 1041409   ;;  %s2549_s17 = scalar_lea.hbm %s2637_s7, %s1855_s29 }
  0x18   : > { %1897 = vmatpush3.bf16.msra.mxu1 %v2036_v2  ;;  %1898 = vmatprep.mubr.msk.bf16.mxu1 %vm2222_vm0, %v2221_v1  ;;  %s288_s23 = scalar_lea.vmem %s2630_s0, %s1789_s20  ;;  %v356_v10 = vunpack.c.l.s4 %v2223_v9  ;;  %v359_v13 = vshrl.u32 %v358_v11, 7  ;;  %v1790_v14 = vld [vmem:[%s2633_s3] ss:$0 sm:$0xff]  ;;  %vm1434_vm5 = vcmask 1042434   ;;  %vm1437_vm6 = vcmask 1043459   ;;  %s2227_s20 = smov [#allocation8]  }
  0x19   : > { %1902 = vmatprep.subr.bf16.mxu0 %v2221_v1  ;;  %1910 = vmatprep.subr.bf16.mxu1 %v2221_v1  ;;  %v293_v4 = vld [vmem:[%s288_s23] sm:$0xf]  ;;  %v1797_v5 = vld [vmem:[%s288_s23 + $0x4] sm:$0xf]  ;;  %vm1440_vm7 = vcmask 1044484   ;;  %vm1443_vm8 = vcmask 1045509  }
  0x1a   : > { %1893 = vmatmul.mubr.msk.bf16.vlgmr.msra.gmra.mxu0 %vm309_vm1, %v293_v4  ;;  %v357_v12 = vunpack.c.0.s8 %v356_v10  ;;  %v2040_v9 = vld [vmem:[%s2632_s2] sm:$0xff]   ;;  %vm1446_vm9 = vcmask 1046534   ;;  %vm1449_vm10 = vcmask 1047559   ;;  %vm1507_vm11 = vcmask 523264  }
  0x1b   : > { %1899 = vmatmul.mubr.msk.bf16.vlgmr.msra.gmra.mxu1 %vm309_vm1, %v1797_v5  ;;  %1903 = vmatpush3.bf16.msra.mxu0 %v2037_v3  ;;  %vm1522_vm12 = vcmask 519168  }
  0x1c   : > { %1906 = vmatprep.mubr.msk.bf16.mxu0 %vm2222_vm0, %v2221_v1  ;;  %1904 = vmatprep.subr.bf16.mxu0 %v2221_v1  ;;  %v360_v15 = vsub.s32 %v357_v12, %v359_v13 }
  0x1d   : > { %v549_v7 = vld [vmem:[#allocation4] sm:$0x3]  ;;  %1914 = vmatprep.mubr.msk.bf16.mxu1 %vm2222_vm0, %v2221_v1  ;;  %v619_v59 = vld [vmem:[#allocation5] sm:$0x3] }
  0x1e   : > { %v550_v8 = vpack.c.bf16 %v549_v7, %v549_v7 }
  0x1f   : > { %1905 = vmatpush3.bf16.msra.mxu0 %v2038_v6 }
  0x20   : > { %1918 = vmatprep.subr.bf16.mxu0 %v2221_v1 }
  0x22   : > { %1907 = vmatmul.mubr.msk.bf16.vlgmr.msra.gmra.mxu0 %vm567_vm3, %v550_v8  ;;  %v2039_v8 = vld [vmem:[%s2632_s2 + $0x8] sm:$0xff]  }
  0x23   : > { %1922 = vmatprep.mubr.msk.bf16.mxu0 %vm2222_vm0, %v2221_v1  ;;  %1911 = vmatpush3.bf16.msra.mxu1 %v2039_v8 }
  0x24   : > { %1912 = vmatprep.subr.bf16.mxu1 %v2221_v1 }
  0x27   : > { %1913 = vmatpush3.bf16.msra.mxu1 %v2040_v9 }
  0x28   : > { %1926 = vmatprep.subr.bf16.mxu1 %v2221_v1 }
  0xda   : > { %v347_v16 = vpop.f32.mrf.mxu0 }
  0xdb   : > { %v473_v17 = vpop.f32.mrf.mxu1  ;;  %v348_v18 = vadd.f32 %v1790_v14, %v347_v16 }
  0xdc   : > { %v474_v19 = vadd.f32 %v1790_v14, %v473_v17  ;;  %v1894_v20 = vpop.f32.mrf.mxu0 }
  0xdd   : > { %v1900_v21 = vpop.f32.mrf.mxu1  ;;  %v354_v22 = vcombine.high %v348_v18, %v348_v18  ;;  %v361_v23 = vrot.slane %v348_v18, %v360_v15 }
  0xde   : > { %v480_v24 = vcombine.high %v474_v19, %v474_v19  ;;  %v487_v25 = vrot.slane %v474_v19, %v360_v15  ;;  %v350_v26 = vpop.f32.mrf.mxu0 }
  0xdf   : > { %v476_v27 = vpop.f32.mrf.mxu1  ;;  %v368_v28 = vrot.slane %v354_v22, %v360_v15  ;;  %v369_v29 = vcombine.high %v361_v23, %v361_v23  ;;  %v377_v30 = vrot.slane %v361_v23, %v360_v15  ;;  %1793 = vst.sshfl [vmem:[#allocation2] sm:$0x1 pattern:$0x73625140] %v361_v23 }
  0xe0   : > { %v494_v31 = vrot.slane %v480_v24, %v360_v15  ;;  %1801 = vst.sshfl [vmem:[#allocation2 + $0x1] sm:$0x1 pattern:$0x73625140] %v487_v25  ;;  %v495_v32 = vcombine.high %v487_v25, %v487_v25  ;;  %v503_v33 = vrot.slane %v487_v25, %v360_v15  ;;  %v1895_v34 = vpop.f32.mrf.mxu0 }
  0xe1   : > { %v1901_v35 = vpop.f32.mrf.mxu1  ;;  %v370_v36 = vcombine.high %v368_v28, %v368_v28  ;;  %v384_v37 = vrot.slane %v368_v28, %v360_v15  ;;  %v391_v38 = vrot.slane %v369_v29, %v360_v15  ;;  %v399_v39 = vcombine.high %v377_v30, %v377_v30  ;;  %1794 = vst.sshfl [vmem:[#allocation2 + $0x2] sm:$0x1 pattern:$0x73625140] %v369_v29 }
  0xe2   : > { %1795 = vst.sshfl [vmem:[#allocation2 + $0x8] sm:$0x1 pattern:$0x73625140] %v368_v28  ;;  %v496_v40 = vcombine.high %v494_v31, %v494_v31  ;;  %v510_v41 = vrot.slane %v494_v31, %v360_v15  ;;  %v517_v42 = vrot.slane %v495_v32, %v360_v15  ;;  %v525_v43 = vcombine.high %v503_v33, %v503_v33  ;;  %v605_v44 = vpop.f32.mrf.mxu0  ;;  %v2041_v35 = vld [vmem:[%s2632_s2 + $0x8] sm:$0xff]  }
  0xe3   : > { %1803 = vst.sshfl [vmem:[#allocation2 + $0x9] sm:$0x1 pattern:$0x73625140] %v494_v31  ;;  %v398_v45 = vrot.slane %v370_v36, %v360_v15  ;;  %v400_v46 = vcombine.high %v384_v37, %v384_v37  ;;  %v401_v47 = vcombine.high %v391_v38, %v391_v38  ;;  %413 = vst [vmem:[#allocation2 + $0x4] sm:$0x1] %v399_v39  ;;  %1919 = vmatpush3.bf16.msra.mxu0 %v2041_v35 }
  0xe4   : > { %1802 = vst.sshfl [vmem:[#allocation2 + $0x3] sm:$0x1 pattern:$0x73625140] %v495_v32  ;;  %v524_v48 = vrot.slane %v496_v40, %v360_v15  ;;  %v526_v49 = vcombine.high %v510_v41, %v510_v41  ;;  %v527_v50 = vcombine.high %v517_v42, %v517_v42  ;;  %539 = vst [vmem:[#allocation2 + $0x5] sm:$0x1] %v525_v43  ;;  %v1908_v51 = vpop.f32.mrf.mxu0  ;;  %1920 = vmatprep.subr.bf16.mxu0 %v2221_v1 }
  0xe5   : > { %1796 = vst.sshfl [vmem:[#allocation2 + $0xa] sm:$0x1 pattern:$0x73625140] %v370_v36  ;;  %v402_v52 = vcombine.high %v398_v45, %v398_v45  ;;  %414 = vst [vmem:[#allocation2 + $0x6] sm:$0x1] %v401_v47 }
  0xe6   : > { %1804 = vst.sshfl [vmem:[#allocation2 + $0xb] sm:$0x1 pattern:$0x73625140] %v496_v40  ;;  %417 = vst [vmem:[#allocation2 + $0xc] sm:$0x1] %v400_v46  ;;  %v528_v53 = vcombine.high %v524_v48, %v524_v48  ;;  %v608_v55 = vpop.f32.mrf.mxu0 }
  0xe7   : > { %540 = vst [vmem:[#allocation2 + $0x7] sm:$0x1] %v527_v50  ;;  %543 = vst [vmem:[#allocation2 + $0xd] sm:$0x1] %v526_v49  ;;  %v548_v54 = vld [vmem:[#allocation2] sm:$0x3] }
  0xe8   : > { %418 = vst [vmem:[#allocation2 + $0xe] sm:$0x1] %v402_v52  ;;  %v611_v56 = vadd.f32 %v605_v44, %v548_v54  ;;  %544 = vst [vmem:[#allocation2 + $0xf] sm:$0x1] %v528_v53  ;;  %v1909_v57 = vpop.f32.mrf.mxu0  ;;  %v2042_v36 = vld [vmem:[%s2632_s2] sm:$0xff]  }
  0xe9   : > { %1921 = vmatpush3.bf16.msra.mxu0 %v2042_v36 }
  0xea   : > { %2057 = vtanh.f32 %v611_v56  ;;  %v1808_v60 = vmul.f32 -1.442695, %v611_v56  ;;  %1934 = vmatprep.subr.bf16.mxu0 %v2221_v1  ;;  %v968_v35 = vld [vmem:[#allocation2 + $0x8] sm:$0x3] }
  0xeb   : > { %v653_v17 = vld [vmem:[#allocation2 + $0x2] sm:$0x3]  ;;  %v758_v44 = vld [vmem:[#allocation2 + $0x4] sm:$0x3] }
  0xec   : > { %2059 = vpow2.f32 %v1808_v60 }
  0xee   : > { %v863_v8 = vld [vmem:[#allocation2 + $0x6] sm:$0x3] }
  0xf7   : > { %v2058_v58 = vpop.eup %2057 }
  0xf8   : > { %626 = vrot.lane.b32.xlu0 %v2058_v58, %s2224_s14 }
  0xf9   : > { %v2060_v61 = vpop.eup %2059 }
  0xfa   : > { %v615_v62 = vadd.f32 1.0, %v2060_v61 }
  0xfc   : > { %621 = vrot.lane.b32.xlu0 %v619_v59, %s2225_s15  ;;  %2061 = vrcp.f32 %v615_v62  ;;  %v2043_v62 = vld [vmem:[%s2632_s2 + $0x8] sm:$0xff]  }
 0x109   : > { %v2062_v63 = vpop.eup %2061 }
 0x16a   : > { %v627_v0 = vpop.permute.xlu0 %626 }
 0x16b   : > { %v629_v2 = vmul.f32 %v2062_v63, %v627_v0 }
 0x16d   : > { %631 = vrot.lane.b32.xlu1 %v629_v2, %s2225_s15 }
 0x16e   : > { %v622_v3 = vpop.permute.xlu0 %621 }
 0x16f   : > { %v624_v4 = vmul.f32 %v2062_v63, %v622_v3 }
 0x1df   : > { %v632_v5 = vpop.permute.xlu1 %631 }
 0x1e0   : > { %v634_v6 = vadd.f32 %v632_v5, %v624_v4 }
 0x1e2   : > { %2063 = vtanh.f32 %v634_v6 }
 0x1ef   : > { %v2064_v7 = vpop.eup %2063 }
 0x1f0   : > { %637 = vrot.lane.b32.xlu1 %v2064_v7, %s2224_s14 }
 0x1f4   : > { %642 = vrot.lane.b32.xlu1 %v634_v6, %s2226_s16 }
 0x262   : > { %v638_v10 = vpop.permute.xlu1 %637 }
 0x263   : > { %v640_v11 = vmul.f32 %v2062_v63, %v638_v10  ;;  %v2044_v63 = vld [vmem:[%s2632_s2] sm:$0xff]  }
 0x265   : > { %647 = vrot.lane.b32.xlu0 %v640_v11, %s2225_s15 }
 0x266   : > { %v643_v12 = vpop.permute.xlu1 %642 }
 0x267   : > { %645 = vst.msk [vmem:[#allocation5] sm:$0x3] %vm545_vm2, %v643_v12 }
 0x26e   : > { %v723_v13 = vld [vmem:[#allocation5] sm:$0x3] }
 0x26f   : > { %725 = vrot.lane.b32.xlu1 %v723_v13, %s2225_s15 }
 0x2d7   : > { %v648_v14 = vpop.permute.xlu0 %647 }
 0x2d8   : > { %650 = vst.msk [vmem:[#allocation4] sm:$0x3] %vm545_vm2, %v648_v14  ;;  %651 = vst.msk [vmem:[#allocation3] sm:$0x3] %vm545_vm2, %v648_v14 }
 0x2df   : > { %v654_v15 = vld [vmem:[#allocation4] sm:$0x3] }
 0x2e0   : > { %v655_v16 = vpack.c.bf16 %v654_v15, %v654_v15 }
 0x2e1   : > { %v726_v30 = vpop.permute.xlu1 %725 }
 0x2e2   : > { %1915 = vmatmul.mubr.msk.bf16.vlgmr.msra.gmra.mxu1 %vm567_vm3, %v655_v16 }
 0x2e3   : > { %1930 = vmatprep.mubr.msk.bf16.mxu1 %vm2222_vm0, %v2221_v1  ;;  %1927 = vmatpush3.bf16.msra.mxu1 %v2043_v62  ;;  %v1073_v62 = vld [vmem:[#allocation2 + $0xa] sm:$0x3] }
 0x2e4   : > { %1928 = vmatprep.subr.bf16.mxu1 %v2221_v1 }
 0x2e7   : > { %1929 = vmatpush3.bf16.msra.mxu1 %v2044_v63 }
 0x2e8   : > { %1942 = vmatprep.subr.bf16.mxu1 %v2221_v1 }
 0x3a2   : > { %v709_v18 = vpop.f32.mrf.mxu1 }
 0x3a3   : > { %v715_v19 = vadd.f32 %v709_v18, %v653_v17 }
 0x3a4   : > { %v1916_v20 = vpop.f32.mrf.mxu1 }
 0x3a5   : > { %2065 = vtanh.f32 %v715_v19  ;;  %v1812_v24 = vmul.f32 -1.442695, %v715_v19 }
 0x3a6   : > { %v712_v21 = vpop.f32.mrf.mxu1 }
 0x3a7   : > { %2067 = vpow2.f32 %v1812_v24 }
 0x3a8   : > { %v1917_v22 = vpop.f32.mrf.mxu1 }
 0x3b2   : > { %v2066_v23 = vpop.eup %2065 }
 0x3b3   : > { %730 = vrot.lane.b32.xlu0 %v2066_v23, %s2224_s14 }
 0x3b4   : > { %v2068_v25 = vpop.eup %2067 }
 0x3b5   : > { %v719_v26 = vadd.f32 1.0, %v2068_v25 }
 0x3b7   : > { %2069 = vrcp.f32 %v719_v26  ;;  %v2045_v26 = vld [vmem:[%s2632_s2 + $0x8] sm:$0xff]  }
 0x3c4   : > { %v2070_v27 = vpop.eup %2069 }
 0x3c5   : > { %v728_v31 = vmul.f32 %v2070_v27, %v726_v30 }
 0x425   : > { %v731_v28 = vpop.permute.xlu0 %730 }
 0x426   : > { %v733_v29 = vmul.f32 %v2070_v27, %v731_v28 }
 0x428   : > { %735 = vrot.lane.b32.xlu0 %v733_v29, %s2225_s15 }
 0x49a   : > { %v736_v32 = vpop.permute.xlu0 %735 }
 0x49b   : > { %v738_v33 = vadd.f32 %v736_v32, %v728_v31 }
 0x49d   : > { %2071 = vtanh.f32 %v738_v33 }
 0x4aa   : > { %v2072_v34 = vpop.eup %2071 }
 0x4ab   : > { %741 = vrot.lane.b32.xlu1 %v2072_v34, %s2224_s14 }
 0x4af   : > { %746 = vrot.lane.b32.xlu1 %v738_v33, %s2226_s16 }
 0x51d   : > { %v742_v37 = vpop.permute.xlu1 %741 }
 0x51e   : > { %v744_v38 = vmul.f32 %v2070_v27, %v742_v37  ;;  %v2046_v27 = vld [vmem:[%s2632_s2] sm:$0xff]  }
 0x520   : > { %751 = vrot.lane.b32.xlu0 %v744_v38, %s2225_s15 }
 0x521   : > { %v747_v39 = vpop.permute.xlu1 %746 }
 0x522   : > { %749 = vst.msk [vmem:[#allocation5] sm:$0x3] %vm545_vm2, %v747_v39 }
 0x529   : > { %v828_v40 = vld [vmem:[#allocation5] sm:$0x3] }
 0x52a   : > { %830 = vrot.lane.b32.xlu1 %v828_v40, %s2225_s15 }
 0x592   : > { %v752_v41 = vpop.permute.xlu0 %751 }
 0x593   : > { %754 = vst.msk [vmem:[#allocation4] sm:$0x3] %vm545_vm2, %v752_v41  ;;  %756 = vst.msk [vmem:[#allocation3 + $0x2] sm:$0x3] %vm545_vm2, %v752_v41 }
 0x59a   : > { %v759_v42 = vld [vmem:[#allocation4] sm:$0x3] }
 0x59b   : > { %v760_v43 = vpack.c.bf16 %v759_v42, %v759_v42 }
 0x59c   : > { %v831_v57 = vpop.permute.xlu1 %830 }
 0x59d   : > { %1923 = vmatmul.mubr.msk.bf16.vlgmr.msra.gmra.mxu0 %vm567_vm3, %v760_v43 }
 0x59e   : > { %1938 = vmatprep.mubr.msk.bf16.mxu0 %vm2222_vm0, %v2221_v1  ;;  %1935 = vmatpush3.bf16.msra.mxu0 %v2045_v26  ;;  %v1178_v26 = vld [vmem:[#allocation2 + $0xc] sm:$0x3] }
 0x59f   : > { %1936 = vmatprep.subr.bf16.mxu0 %v2221_v1 }
 0x5a2   : > { %1937 = vmatpush3.bf16.msra.mxu0 %v2046_v27 }
 0x5a3   : > { %1950 = vmatprep.subr.bf16.mxu0 %v2221_v1 }
 0x65d   : > { %v814_v45 = vpop.f32.mrf.mxu0 }
 0x65e   : > { %v820_v46 = vadd.f32 %v814_v45, %v758_v44 }
 0x65f   : > { %v1924_v47 = vpop.f32.mrf.mxu0 }
 0x660   : > { %2073 = vtanh.f32 %v820_v46  ;;  %v1816_v51 = vmul.f32 -1.442695, %v820_v46 }
 0x661   : > { %v817_v48 = vpop.f32.mrf.mxu0 }
 0x662   : > { %2075 = vpow2.f32 %v1816_v51 }
 0x663   : > { %v1925_v49 = vpop.f32.mrf.mxu0 }
 0x66d   : > { %v2074_v50 = vpop.eup %2073 }
 0x66e   : > { %835 = vrot.lane.b32.xlu0 %v2074_v50, %s2224_s14 }
 0x66f   : > { %v2076_v52 = vpop.eup %2075 }
 0x670   : > { %v824_v53 = vadd.f32 1.0, %v2076_v52 }
 0x672   : > { %2077 = vrcp.f32 %v824_v53  ;;  %v2047_v53 = vld [vmem:[%s2632_s2 + $0x8] sm:$0xff]  }
 0x67f   : > { %v2078_v54 = vpop.eup %2077 }
 0x680   : > { %v833_v58 = vmul.f32 %v2078_v54, %v831_v57 }
 0x6e0   : > { %v836_v55 = vpop.permute.xlu0 %835 }
 0x6e1   : > { %v838_v56 = vmul.f32 %v2078_v54, %v836_v55 }
 0x6e3   : > { %840 = vrot.lane.b32.xlu0 %v838_v56, %s2225_s15 }
 0x755   : > { %v841_v59 = vpop.permute.xlu0 %840 }
 0x756   : > { %v843_v60 = vadd.f32 %v841_v59, %v833_v58 }
 0x758   : > { %2079 = vtanh.f32 %v843_v60 }
 0x765   : > { %v2080_v61 = vpop.eup %2079 }
 0x766   : > { %846 = vrot.lane.b32.xlu1 %v2080_v61, %s2224_s14 }
 0x76a   : > { %851 = vrot.lane.b32.xlu1 %v843_v60, %s2226_s16 }
 0x7d8   : > { %v847_v0 = vpop.permute.xlu1 %846 }
 0x7d9   : > { %v849_v2 = vmul.f32 %v2078_v54, %v847_v0  ;;  %v2048_v54 = vld [vmem:[%s2632_s2] sm:$0xff]  }
 0x7db   : > { %856 = vrot.lane.b32.xlu0 %v849_v2, %s2225_s15 }
 0x7dc   : > { %v852_v3 = vpop.permute.xlu1 %851 }
 0x7dd   : > { %854 = vst.msk [vmem:[#allocation5] sm:$0x3] %vm545_vm2, %v852_v3 }
 0x7e4   : > { %v933_v4 = vld [vmem:[#allocation5] sm:$0x3] }
 0x7e5   : > { %935 = vrot.lane.b32.xlu1 %v933_v4, %s2225_s15 }
 0x84d   : > { %v857_v5 = vpop.permute.xlu0 %856 }
 0x84e   : > { %859 = vst.msk [vmem:[#allocation4] sm:$0x3] %vm545_vm2, %v857_v5  ;;  %861 = vst.msk [vmem:[#allocation3 + $0x4] sm:$0x3] %vm545_vm2, %v857_v5 }
 0x855   : > { %v864_v6 = vld [vmem:[#allocation4] sm:$0x3] }
 0x856   : > { %v865_v7 = vpack.c.bf16 %v864_v6, %v864_v6 }
 0x857   : > { %v936_v21 = vpop.permute.xlu1 %935 }
 0x858   : > { %1931 = vmatmul.mubr.msk.bf16.vlgmr.msra.gmra.mxu1 %vm567_vm3, %v865_v7 }
 0x859   : > { %1946 = vmatprep.mubr.msk.bf16.mxu1 %vm2222_vm0, %v2221_v1  ;;  %1943 = vmatpush3.bf16.msra.mxu1 %v2047_v53  ;;  %v1283_v53 = vld [vmem:[#allocation2 + $0xe] sm:$0x3] }
 0x85a   : > { %1944 = vmatprep.subr.bf16.mxu1 %v2221_v1 }
 0x85d   : > { %1945 = vmatpush3.bf16.msra.mxu1 %v2048_v54 }
 0x85e   : > { %1958 = vmatprep.subr.bf16.mxu1 %v2221_v1 }
 0x918   : > { %v919_v9 = vpop.f32.mrf.mxu1 }
 0x919   : > { %v925_v10 = vadd.f32 %v919_v9, %v863_v8 }
 0x91a   : > { %v1932_v11 = vpop.f32.mrf.mxu1 }
 0x91b   : > { %2081 = vtanh.f32 %v925_v10  ;;  %v1820_v15 = vmul.f32 -1.442695, %v925_v10 }
 0x91c   : > { %v922_v12 = vpop.f32.mrf.mxu1 }
 0x91d   : > { %2083 = vpow2.f32 %v1820_v15 }
 0x91e   : > { %v1933_v13 = vpop.f32.mrf.mxu1 }
 0x928   : > { %v2082_v14 = vpop.eup %2081 }
 0x929   : > { %940 = vrot.lane.b32.xlu0 %v2082_v14, %s2224_s14 }
 0x92a   : > { %v2084_v16 = vpop.eup %2083 }
 0x92b   : > { %v929_v17 = vadd.f32 1.0, %v2084_v16 }
 0x92d   : > { %2085 = vrcp.f32 %v929_v17  ;;  %v2049_v17 = vld [vmem:[%s2632_s2 + $0x8] sm:$0xff]  }
 0x93a   : > { %v2086_v18 = vpop.eup %2085 }
 0x93b   : > { %v938_v22 = vmul.f32 %v2086_v18, %v936_v21 }
 0x99b   : > { %v941_v19 = vpop.permute.xlu0 %940 }
 0x99c   : > { %v943_v20 = vmul.f32 %v2086_v18, %v941_v19 }
 0x99e   : > { %945 = vrot.lane.b32.xlu0 %v943_v20, %s2225_s15 }
 0xa10   : > { %v946_v23 = vpop.permute.xlu0 %945 }
 0xa11   : > { %v948_v24 = vadd.f32 %v946_v23, %v938_v22 }
 0xa13   : > { %2087 = vtanh.f32 %v948_v24 }
 0xa20   : > { %v2088_v25 = vpop.eup %2087 }
 0xa21   : > { %951 = vrot.lane.b32.xlu1 %v2088_v25, %s2224_s14 }
 0xa25   : > { %956 = vrot.lane.b32.xlu1 %v948_v24, %s2226_s16 }
 0xa93   : > { %v952_v28 = vpop.permute.xlu1 %951 }
 0xa94   : > { %v954_v29 = vmul.f32 %v2086_v18, %v952_v28  ;;  %v2050_v18 = vld [vmem:[%s2632_s2] sm:$0xff]  }
 0xa96   : > { %961 = vrot.lane.b32.xlu0 %v954_v29, %s2225_s15 }
 0xa97   : > { %v957_v30 = vpop.permute.xlu1 %956 }
 0xa98   : > { %959 = vst.msk [vmem:[#allocation5] sm:$0x3] %vm545_vm2, %v957_v30 }
 0xa9f   : > { %v1038_v31 = vld [vmem:[#allocation5] sm:$0x3] }
 0xaa0   : > { %1040 = vrot.lane.b32.xlu1 %v1038_v31, %s2225_s15 }
 0xb08   : > { %v962_v32 = vpop.permute.xlu0 %961 }
 0xb09   : > { %964 = vst.msk [vmem:[#allocation4] sm:$0x3] %vm545_vm2, %v962_v32  ;;  %966 = vst.msk [vmem:[#allocation3 + $0x6] sm:$0x3] %vm545_vm2, %v962_v32 }
 0xb10   : > { %v969_v33 = vld [vmem:[#allocation4] sm:$0x3] }
 0xb11   : > { %v970_v34 = vpack.c.bf16 %v969_v33, %v969_v33 }
 0xb12   : > { %v1041_v48 = vpop.permute.xlu1 %1040 }
 0xb13   : > { %1939 = vmatmul.mubr.msk.bf16.vlgmr.msra.gmra.mxu0 %vm567_vm3, %v970_v34 }
 0xb14   : > { %1954 = vmatprep.mubr.msk.bf16.mxu0 %vm2222_vm0, %v2221_v1  ;;  %1951 = vmatpush3.bf16.msra.mxu0 %v2049_v17  ;;  %v1526_v17 = vld [vmem:[#allocation3 + $0x5] sm:$0x1] }
 0xb15   : > { %1952 = vmatprep.subr.bf16.mxu0 %v2221_v1 }
 0xb18   : > { %1953 = vmatpush3.bf16.msra.mxu0 %v2050_v18 }
 0xb19   : > { %1966 = vmatprep.subr.bf16.mxu0 %v2221_v1 }
 0xbd3   : > { %v1024_v36 = vpop.f32.mrf.mxu0 }
 0xbd4   : > { %v1030_v37 = vadd.f32 %v1024_v36, %v968_v35 }
 0xbd5   : > { %v1940_v38 = vpop.f32.mrf.mxu0 }
 0xbd6   : > { %2089 = vtanh.f32 %v1030_v37  ;;  %v1824_v42 = vmul.f32 -1.442695, %v1030_v37 }
 0xbd7   : > { %v1027_v39 = vpop.f32.mrf.mxu0 }
 0xbd8   : > { %2091 = vpow2.f32 %v1824_v42 }
 0xbd9   : > { %v1941_v40 = vpop.f32.mrf.mxu0 }
 0xbe3   : > { %v2090_v41 = vpop.eup %2089 }
 0xbe4   : > { %1045 = vrot.lane.b32.xlu0 %v2090_v41, %s2224_s14 }
 0xbe5   : > { %v2092_v43 = vpop.eup %2091 }
 0xbe6   : > { %v1034_v44 = vadd.f32 1.0, %v2092_v43 }
 0xbe8   : > { %2093 = vrcp.f32 %v1034_v44  ;;  %v2051_v44 = vld [vmem:[%s2632_s2 + $0x8] sm:$0xff]  }
 0xbf5   : > { %v2094_v45 = vpop.eup %2093 }
 0xbf6   : > { %v1043_v49 = vmul.f32 %v2094_v45, %v1041_v48 }
 0xc56   : > { %v1046_v46 = vpop.permute.xlu0 %1045 }
 0xc57   : > { %v1048_v47 = vmul.f32 %v2094_v45, %v1046_v46 }
 0xc59   : > { %1050 = vrot.lane.b32.xlu0 %v1048_v47, %s2225_s15 }
 0xccb   : > { %v1051_v50 = vpop.permute.xlu0 %1050 }
 0xccc   : > { %v1053_v51 = vadd.f32 %v1051_v50, %v1043_v49 }
 0xcce   : > { %2095 = vtanh.f32 %v1053_v51 }
 0xcdb   : > { %v2096_v52 = vpop.eup %2095 }
 0xcdc   : > { %1056 = vrot.lane.b32.xlu1 %v2096_v52, %s2224_s14 }
 0xce0   : > { %1061 = vrot.lane.b32.xlu1 %v1053_v51, %s2226_s16 }
 0xd4e   : > { %v1057_v55 = vpop.permute.xlu1 %1056 }
 0xd4f   : > { %v1059_v56 = vmul.f32 %v2094_v45, %v1057_v55  ;;  %v2052_v45 = vld [vmem:[%s2632_s2] sm:$0xff]  }
 0xd51   : > { %1066 = vrot.lane.b32.xlu0 %v1059_v56, %s2225_s15 }
 0xd52   : > { %v1062_v57 = vpop.permute.xlu1 %1061 }
 0xd53   : > { %1064 = vst.msk [vmem:[#allocation5] sm:$0x3] %vm545_vm2, %v1062_v57 }
 0xd5a   : > { %v1143_v58 = vld [vmem:[#allocation5] sm:$0x3] }
 0xd5b   : > { %1145 = vrot.lane.b32.xlu1 %v1143_v58, %s2225_s15 }
 0xdc3   : > { %v1067_v59 = vpop.permute.xlu0 %1066 }
 0xdc4   : > { %1069 = vst.msk [vmem:[#allocation4] sm:$0x3] %vm545_vm2, %v1067_v59  ;;  %1071 = vst.msk [vmem:[#allocation3 + $0x8] sm:$0x3] %vm545_vm2, %v1067_v59 }
 0xdcb   : > { %v1074_v60 = vld [vmem:[#allocation4] sm:$0x3] }
 0xdcc   : > { %v1075_v61 = vpack.c.bf16 %v1074_v60, %v1074_v60 }
 0xdcd   : > { %v1146_v12 = vpop.permute.xlu1 %1145 }
 0xdce   : > { %1947 = vmatmul.mubr.msk.bf16.vlgmr.msra.gmra.mxu1 %vm567_vm3, %v1075_v61 }
 0xdcf   : > { %1962 = vmatprep.mubr.msk.bf16.mxu1 %vm2222_vm0, %v2221_v1  ;;  %1959 = vmatpush3.bf16.msra.mxu1 %v2051_v44 }
 0xdd0   : > { %1960 = vmatprep.subr.bf16.mxu1 %v2221_v1 }
 0xdd3   : > { %1961 = vmatpush3.bf16.msra.mxu1 %v2052_v45 }
 0xdd4   : > { %1974 = vmatprep.subr.bf16.mxu1 %v2221_v1 }
 0xe8e   : > { %v1129_v63 = vpop.f32.mrf.mxu1 }
 0xe8f   : > { %v1135_v0 = vadd.f32 %v1129_v63, %v1073_v62 }
 0xe90   : > { %v1948_v2 = vpop.f32.mrf.mxu1 }
 0xe91   : > { %2097 = vtanh.f32 %v1135_v0  ;;  %v1828_v6 = vmul.f32 -1.442695, %v1135_v0 }
 0xe92   : > { %v1132_v3 = vpop.f32.mrf.mxu1 }
 0xe93   : > { %2099 = vpow2.f32 %v1828_v6 }
 0xe94   : > { %v1949_v4 = vpop.f32.mrf.mxu1 }
 0xe9e   : > { %v2098_v5 = vpop.eup %2097 }
 0xe9f   : > { %1150 = vrot.lane.b32.xlu0 %v2098_v5, %s2224_s14 }
 0xea0   : > { %v2100_v7 = vpop.eup %2099 }
 0xea1   : > { %v1139_v8 = vadd.f32 1.0, %v2100_v7 }
 0xea3   : > { %2101 = vrcp.f32 %v1139_v8  ;;  %v2053_v8 = vld [vmem:[%s2634_s4 + $0x8] sm:$0xff]  }
 0xeb0   : > { %v2102_v9 = vpop.eup %2101 }
 0xeb1   : > { %v1148_v13 = vmul.f32 %v2102_v9, %v1146_v12 }
 0xf11   : > { %v1151_v10 = vpop.permute.xlu0 %1150 }
 0xf12   : > { %v1153_v11 = vmul.f32 %v2102_v9, %v1151_v10  ;;  %v2055_v10 = vld [vmem:[%s2634_s4] sm:$0xff]  }
 0xf14   : > { %1155 = vrot.lane.b32.xlu0 %v1153_v11, %s2225_s15  ;;  %v2056_v11 = vld [vmem:[%s2634_s4] sm:$0xff]  }
 0xf86   : > { %v1156_v14 = vpop.permute.xlu0 %1155 }
 0xf87   : > { %v1158_v15 = vadd.f32 %v1156_v14, %v1148_v13  ;;  %v1388_v14 = vld [vmem:[#allocation3 + $0x2] sm:$0x1] }
 0xf88   : > { %v1396_v18 = vpack.c.bf16 %v1388_v14, %v1388_v14 }
 0xf89   : > { %2103 = vtanh.f32 %v1158_v15 }
 0xf96   : > { %v2104_v16 = vpop.eup %2103 }
 0xf97   : > { %1161 = vrot.lane.b32.xlu1 %v2104_v16, %s2224_s14  ;;  %v1389_v16 = vld [vmem:[#allocation3 + $0x4] sm:$0x1] }
 0xf9b   : > { %1166 = vrot.lane.b32.xlu1 %v1158_v15, %s2226_s16  ;;  %v1525_v15 = vld [vmem:[#allocation3 + $0x3] sm:$0x1] }
0x1009   : > { %v1162_v19 = vpop.permute.xlu1 %1161 }
0x100a   : > { %v1164_v20 = vmul.f32 %v2102_v9, %v1162_v19  ;;  %v2054_v9 = vld [vmem:[%s2634_s4 + $0x8] sm:$0xff]   ;;  %v1390_v19 = vld [vmem:[#allocation3 + $0x6] sm:$0x1] }
0x100c   : > { %1171 = vrot.lane.b32.xlu0 %v1164_v20, %s2225_s15  ;;  %v1533_v20 = vpack.c.bf16 %v1525_v15, %v1525_v15 }
0x100d   : > { %v1167_v21 = vpop.permute.xlu1 %1166 }
0x100e   : > { %1169 = vst.msk [vmem:[#allocation5] sm:$0x3] %vm545_vm2, %v1167_v21  ;;  %v1387_v21 = vld [vmem:[#allocation3] sm:$0x1] }
0x1015   : > { %v1248_v22 = vld [vmem:[#allocation5] sm:$0x3] }
0x1016   : > { %1250 = vrot.lane.b32.xlu1 %v1248_v22, %s2225_s15  ;;  %v1397_v22 = vpack.c.bf16 %v1389_v16, %v1389_v16 }
0x107e   : > { %v1172_v23 = vpop.permute.xlu0 %1171 }
0x107f   : > { %1174 = vst.msk [vmem:[#allocation4] sm:$0x3] %vm545_vm2, %v1172_v23  ;;  %1176 = vst.msk [vmem:[#allocation3 + $0xa] sm:$0x3] %vm545_vm2, %v1172_v23  ;;  %v1527_v23 = vld [vmem:[#allocation3 + $0x7] sm:$0x1] }
0x1086   : > { %v1179_v24 = vld [vmem:[#allocation4] sm:$0x3] }
0x1087   : > { %v1180_v25 = vpack.c.bf16 %v1179_v24, %v1179_v24  ;;  %v1534_v24 = vpack.c.bf16 %v1526_v17, %v1526_v17 }
0x1088   : > { %v1251_v39 = vpop.permute.xlu1 %1250 }
0x1089   : > { %1955 = vmatmul.mubr.msk.bf16.vlgmr.msra.gmra.mxu0 %vm567_vm3, %v1180_v25  ;;  %v1391_v25 = vld [vmem:[#allocation3 + $0x8] sm:$0x1] }
0x108a   : > { %1970 = vmatprep.mubr.msk.bf16.mxu0 %vm2222_vm0, %v2221_v1  ;;  %1967 = vmatpush3.bf16.msra.mxu0 %v2053_v8 }
0x108b   : > { %1968 = vmatprep.subr.bf16.mxu0 %v2221_v1 }
0x108e   : > { %1969 = vmatpush3.bf16.msra.mxu0 %v2055_v10 }
0x1149   : > { %v1234_v27 = vpop.f32.mrf.mxu0 }
0x114a   : > { %v1240_v28 = vadd.f32 %v1234_v27, %v1178_v26  ;;  %v1528_v26 = vld [vmem:[#allocation3 + $0x9] sm:$0x1]  ;;  %v1398_v27 = vpack.c.bf16 %v1390_v19, %v1390_v19 }
0x114b   : > { %v1956_v29 = vpop.f32.mrf.mxu0 }
0x114c   : > { %2105 = vtanh.f32 %v1240_v28  ;;  %v1832_v33 = vmul.f32 -1.442695, %v1240_v28  ;;  %v1423_v28 = vunpack.c.l.b16 %v1396_v18  ;;  %v1524_v29 = vld [vmem:[#allocation3 + $0x1] sm:$0x1]  ;;  %v1425_v45 = vunpack.c.l.b16 %v1398_v27 }
0x114d   : > { %v1237_v30 = vpop.f32.mrf.mxu0 }
0x114e   : > { %2107 = vpow2.f32 %v1832_v33  ;;  %v1529_v30 = vld [vmem:[#allocation3 + $0xb] sm:$0x1] }
0x114f   : > { %v1957_v31 = vpop.f32.mrf.mxu0 }
0x1159   : > { %v2106_v32 = vpop.eup %2105 }
0x115a   : > { %1255 = vrot.lane.b32.xlu0 %v2106_v32, %s2224_s14  ;;  %v1395_v32 = vpack.c.bf16 %v1387_v21, %v1387_v21 }
0x115b   : > { %v2108_v34 = vpop.eup %2107 }
0x115c   : > { %v1244_v35 = vadd.f32 1.0, %v2108_v34  ;;  %v1535_v34 = vpack.c.bf16 %v1527_v23, %v1527_v23 }
0x115e   : > { %2109 = vrcp.f32 %v1244_v35  ;;  %v1560_v35 = vunpack.c.l.b16 %v1533_v20 }
0x116b   : > { %v2110_v36 = vpop.eup %2109 }
0x116c   : > { %v1253_v40 = vmul.f32 %v2110_v36, %v1251_v39  ;;  %v1536_v39 = vpack.c.bf16 %v1528_v26, %v1528_v26 }
0x11cc   : > { %v1256_v37 = vpop.permute.xlu0 %1255 }
0x11cd   : > { %v1258_v38 = vmul.f32 %v2110_v36, %v1256_v37  ;;  %v1399_v37 = vpack.c.bf16 %v1391_v25, %v1391_v25 }
0x11cf   : > { %1260 = vrot.lane.b32.xlu0 %v1258_v38, %s2225_s15  ;;  %v1424_v38 = vunpack.c.l.b16 %v1397_v22 }
0x1241   : > { %v1261_v41 = vpop.permute.xlu0 %1260 }
0x1242   : > { %v1263_v42 = vadd.f32 %v1261_v41, %v1253_v40  ;;  %v1561_v40 = vunpack.c.l.b16 %v1534_v24 }
0x1244   : > { %2111 = vtanh.f32 %v1263_v42 }
0x1251   : > { %v2112_v43 = vpop.eup %2111 }
0x1252   : > { %1266 = vrot.lane.b32.xlu1 %v2112_v43, %s2224_s14  ;;  %v1537_v43 = vpack.c.bf16 %v1529_v30, %v1529_v30 }
0x1256   : > { %1271 = vrot.lane.b32.xlu1 %v1263_v42, %s2226_s16  ;;  %v1532_v42 = vpack.c.bf16 %v1524_v29, %v1524_v29  ;;  %v1837_v29 = vld [vmem:[%s2635_s5] ss:$0 sm:$0xff] }
0x12c4   : > { %v1267_v46 = vpop.permute.xlu1 %1266 }
0x12c5   : > { %v1269_v47 = vmul.f32 %v2110_v36, %v1267_v46  ;;  %v1430_v46 = vrot.slane %v1423_v28, 7 }
0x12c7   : > { %1276 = vrot.lane.b32.xlu0 %v1269_v47, %s2225_s15 }
0x12c8   : > { %v1272_v48 = vpop.permute.xlu1 %1271 }
0x12c9   : > { %1274 = vst.msk [vmem:[#allocation5] sm:$0x3] %vm545_vm2, %v1272_v48  ;;  %v1422_v48 = vunpack.c.l.b16 %v1395_v32 }
0x12d0   : > { %v1353_v49 = vld [vmem:[#allocation5] sm:$0x3] }
0x12d1   : > { %1355 = vrot.lane.b32.xlu1 %v1353_v49, %s2225_s15  ;;  %v1562_v49 = vunpack.c.l.b16 %v1535_v34 }
0x1339   : > { %v1277_v50 = vpop.permute.xlu0 %1276 }
0x133a   : > { %1279 = vst.msk [vmem:[#allocation4] sm:$0x3] %vm545_vm2, %v1277_v50  ;;  %1281 = vst.msk [vmem:[#allocation3 + $0xc] sm:$0x3] %vm545_vm2, %v1277_v50  ;;  %v1567_v50 = vrot.slane %v1560_v35, 7 }
0x1341   : > { %v1284_v51 = vld [vmem:[#allocation4] sm:$0x3]  ;;  %v1393_v31 = vld [vmem:[#allocation3 + $0xc] sm:$0x1]  ;;  %v1530_v33 = vld [vmem:[#allocation3 + $0xd] sm:$0x1] }
0x1342   : > { %v1285_v52 = vpack.c.bf16 %v1284_v51, %v1284_v51  ;;  %v1401_v44 = vpack.c.bf16 %v1393_v31, %v1393_v31  ;;  %v1538_v47 = vpack.c.bf16 %v1530_v33, %v1530_v33  ;;  %v1426_v51 = vunpack.c.l.b16 %v1399_v37 }
0x1343   : > { %v1356_v3 = vpop.permute.xlu1 %1355 }
0x1344   : > { %1963 = vmatmul.mubr.msk.bf16.vlgmr.msra.gmra.mxu1 %vm567_vm3, %v1285_v52  ;;  %v1433_v52 = vrot.slane %v1424_v38, 6 }
0x1345   : > { %1978 = vmatprep.mubr.msk.bf16.mxu1 %vm2222_vm0, %v2221_v1  ;;  %1975 = vmatpush3.bf16.msra.mxu1 %v2054_v9 }
0x1346   : > { %1976 = vmatprep.subr.bf16.mxu1 %v2221_v1  ;;  %v1392_v1 = vld [vmem:[#allocation3 + $0xa] sm:$0x1] }
0x1347   : > { %v1400_v41 = vpack.c.bf16 %v1392_v1, %v1392_v1 }
0x1349   : > { %1977 = vmatpush3.bf16.msra.mxu1 %v2056_v11 }
0x1404   : > { %v1339_v54 = vpop.f32.mrf.mxu1 }
0x1405   : > { %v1345_v55 = vadd.f32 %v1339_v54, %v1283_v53  ;;  %v1563_v53 = vunpack.c.l.b16 %v1536_v39  ;;  %v1569_v54 = vrot.slane %v1561_v40, 6 }
0x1406   : > { %v1964_v56 = vpop.f32.mrf.mxu1 }
0x1407   : > { %2113 = vtanh.f32 %v1345_v55  ;;  %v1836_v60 = vmul.f32 -1.442695, %v1345_v55  ;;  %v1427_v55 = vunpack.c.l.b16 %v1400_v41  ;;  %v1559_v56 = vunpack.c.l.b16 %v1532_v42 }
0x1408   : > { %v1342_v57 = vpop.f32.mrf.mxu1 }
0x1409   : > { %2115 = vpow2.f32 %v1836_v60  ;;  %v1564_v57 = vunpack.c.l.b16 %v1537_v43  ;;  %v1436_v60 = vrot.slane %v1425_v45, 5  ;;  %v1442_v9 = vrot.slane %v1427_v55, 3 }
0x140a   : > { %v1965_v58 = vpop.f32.mrf.mxu1 }
0x140b   : > { %v1428_v58 = vunpack.c.l.b16 %v1401_v44  ;;  %v1575_v11 = vrot.slane %v1564_v57, 3 }
0x1414   : > { %v2114_v59 = vpop.eup %2113 }
0x1415   : > { %1360 = vrot.lane.b32.xlu0 %v2114_v59, %s2224_s14  ;;  %v1432_v59 = vsel %vm1431_vm4, %v1430_v46, %v1422_v48 }
0x1416   : > { %v2116_v61 = vpop.eup %2115 }
0x1417   : > { %v1349_v62 = vadd.f32 1.0, %v2116_v61  ;;  %v1565_v61 = vunpack.c.l.b16 %v1538_v47 }
0x1419   : > { %2117 = vrcp.f32 %v1349_v62  ;;  %v1568_v62 = vsel %vm1431_vm4, %v1567_v50, %v1559_v56  ;;  %v1577_v14 = vrot.slane %v1565_v61, 2 }
0x1426   : > { %v2118_v63 = vpop.eup %2117 }
0x1427   : > { %v1358_v4 = vmul.f32 %v2118_v63, %v1356_v3  ;;  %v1439_v3 = vrot.slane %v1426_v51, 4 }
0x1487   : > { %v1361_v0 = vpop.permute.xlu0 %1360 }
0x1488   : > { %v1363_v2 = vmul.f32 %v2118_v63, %v1361_v0 }
0x148a   : > { %1365 = vrot.lane.b32.xlu0 %v1363_v2, %s2225_s15  ;;  %v1435_v2 = vsel %vm1434_vm5, %v1433_v52, %v1432_v59 }
0x14fc   : > { %v1366_v5 = vpop.permute.xlu0 %1365 }
0x14fd   : > { %v2503_v6 = vadd.f32 %v1366_v5, %v1358_v4  ;;  %v1570_v5 = vsel %vm1434_vm5, %v1569_v54, %v1568_v62 }
0x14ff   : > { %2119 = vtanh.f32 %v2503_v6 }
0x150c   : > { %v2120_v7 = vpop.eup %2119 }
0x150d   : > { %1371 = vrot.lane.b32.xlu1 %v2120_v7, %s2224_s14  ;;  %v1573_v7 = vrot.slane %v1563_v53, 4 }
0x157f   : > { %v1372_v12 = vpop.permute.xlu1 %1371 }
0x1580   : > { %v1374_v13 = vmul.f32 %v2118_v63, %v1372_v12  ;;  %v1571_v63 = vrot.slane %v1562_v49, 5  ;;  %v1438_v12 = vsel %vm1437_vm6, %v1436_v60, %v1435_v2 }
0x1581   : > { %v1441_v18 = vsel %vm1440_vm7, %v1439_v3, %v1438_v12 }
0x1582   : > { %1381 = vrot.lane.b32.xlu0 %v1374_v13, %s2225_s15  ;;  %v1445_v13 = vrot.slane %v1428_v58, 2  ;;  %v1572_v17 = vsel %vm1437_vm6, %v1571_v63, %v1570_v5  ;;  %v1444_v20 = vsel %vm1443_vm8, %v1442_v9, %v1441_v18  ;;  %s2533_s15 = sand.u32 1, %s2211_s25  }
0x1583   : > { %v1574_v19 = vsel %vm1440_vm7, %v1573_v7, %v1572_v17  ;;  %s1787_s22 = sshll.u32 %s2533_s15, 3  ;;  %s1659_s18 = scalar_lea.sflag [#allocation9], %s2533_s15 }
0x1584   : > { %v1576_v22 = vsel %vm1443_vm8, %v1575_v11, %v1574_v19  ;;  %v1447_v24 = vsel %vm1446_vm9, %v1445_v13, %v1444_v20  ;;  %s283_s23 = scalar_lea.vmem [#allocation8], %s1787_s22 }
0x1585   : > { %v1578_v25 = vsel %vm1446_vm9, %v1577_v14, %v1576_v22  ;;  %s1688_s8 = sshll.u32 %s283_s23, 4  ;;  %s2551_s8 = int_to_ptr.vmem [resolvable:$true] %s1688_s8 }
0x1586   : > { %s2129_s19 = scalar_lea.vmem %s2551_s8, 128 }
0x1587   : > { %p2130_p11 = scmp.ne.s32.totalorder %s2551_s8, %s2129_s19 }
0x1589   : > { %p2131_p12 = pnand %p2130_p11, %p2310_p5 }
0x158b   : > { %p2132_p13 = pneg %p2131_p12 }
0x15f4   : > { %v1382_v36 = vpop.permute.xlu0 %1381 }
0x15f5   : > { %1384 = vst.msk [vmem:[#allocation4] sm:$0x3] %vm545_vm2, %v1382_v36  ;;  %1386 = vst.msk [vmem:[#allocation3 + $0xe] sm:$0x3] %vm545_vm2, %v1382_v36 }
0x15fc   : > { %v1394_v0 = vld [vmem:[#allocation3 + $0xe] sm:$0x1]  ;;  %v1531_v4 = vld [vmem:[#allocation3 + $0xf] sm:$0x1] }
0x15fd   : > { %v1402_v8 = vpack.c.bf16 %v1394_v0, %v1394_v0  ;;  %v1539_v10 = vpack.c.bf16 %v1531_v4, %v1531_v4 }
0x15ff   : > { %v1429_v15 = vunpack.c.l.b16 %v1402_v8  ;;  %v1566_v16 = vunpack.c.l.b16 %v1539_v10 }
0x1601   : > { %v1448_v21 = vrot.slane %v1429_v15, 1  ;;  %v1579_v23 = vrot.slane %v1566_v16, 1 }
0x1603   : > { %v1450_v26 = vsel %vm1449_vm10, %v1448_v21, %v1447_v24  ;;  %v1580_v1 = vsel %vm1449_vm10, %v1579_v23, %v1578_v25 }
0x1604   : > { %v1451_v27 = vpack.c.b16 %v1450_v26, %v1450_v26  ;;  %v1581_v28 = vpack.c.b16 %v1580_v1, %v1580_v1 }
0x1606   : > { %1971 = vmatmul.mubr.msk.bf16.vlgmr.msra.gmra.mxu0 %vm567_vm3, %v1451_v27  ;;  %1979 = vmatmul.mubr.msk.bf16.vlgmr.msra.gmra.mxu1 %vm567_vm3, %v1581_v28 }
0x16c6   : > { %v1501_v30 = vpop.f32.mrf.mxu0  ;;  %v1631_v31 = vpop.f32.mrf.mxu1 }
0x16c7   : > { %v1502_v32 = vadd.f32 %v1837_v29, %v1501_v30  ;;  %v1632_v33 = vadd.f32 %v1837_v29, %v1631_v31 }
0x16c8   : > { %v1972_v34 = vpop.f32.mrf.mxu0  ;;  %v1980_v35 = vpop.f32.mrf.mxu1 }
0x16c9   : > { %v1521_v36 = vpack.c.bf16 %v1502_v32, %v1502_v32  ;;  %v1650_v37 = vpack.c.bf16 %v1632_v33, %v1632_v33  ;;  %v1637_v38 = vsel %vm1507_vm11, %v1632_v33, -inf  ;;  %v1508_v39 = vsel %vm1507_vm11, %v1502_v32, -inf }
0x16ca   : > { %1638 = vmax.xlane.f32.xlu0 %v1637_v38  ;;  %v1634_v40 = vpop.f32.mrf.mxu1  ;;  %1509 = vmax.xlane.f32.xlu1 %v1508_v39  ;;  %v1504_v41 = vpop.f32.mrf.mxu0 }
0x16cb   : > { %1523 = vst.msk [vmem:[%s283_s23] sm:$0xf] %vm1522_vm12, %v1521_v36  ;;  %1845 = vst.msk [vmem:[%s283_s23 + $0x4] sm:$0xf] %vm1522_vm12, %v1650_v37 }
0x16cc   : > { %v1973_v42 = vpop.f32.mrf.mxu0  ;;  %v1981_v43 = vpop.f32.mrf.mxu1 }
0x1753   : > { %v1639_v44 = vpop.xlane.xlu0 %1638  ;;  %v1510_v45 = vpop.xlane.xlu1 %1509 }
0x1754   : > { %v1640_v46 = vsub.f32 %v1632_v33, %v1639_v44  ;;  %v1511_v47 = vsub.f32 %v1502_v32, %v1510_v45 }
0x1756   : > { %v1641_v48 = vmul.f32 1.442695, %v1640_v46  ;;  %v1512_v49 = vmul.f32 1.442695, %v1511_v47 }
0x1758   : > { %2121 = vpow2.f32 %v1641_v48 }
0x1759   : > { %2123 = vpow2.f32 %v1512_v49 }
0x1765   : > { %v2122_v50 = vpop.eup %2121 }
0x1766   : > { %v2124_v51 = vpop.eup %2123  ;;  %v1643_v52 = vsel %vm1507_vm11, %v2122_v50, 0.0 }
0x1767   : > { %1644 = vadd.xlane.f32.xlu1 %v1643_v52  ;;  %v1514_v53 = vsel %vm1507_vm11, %v2124_v51, 0.0 }
0x1768   : > { %1515 = vadd.xlane.f32.xlu0 %v1514_v53 }
0x177e   : > { %1376 = vrot.lane.b32.xlu0 %v2503_v6, %s2226_s16  ;;  %s2133_s16 = sshll.u32 %s2227_s20, 4  ;;  %s2134_s16 = int_to_ptr.vmem [resolvable:$false] %s2133_s16 }
0x177f   : > { %s2135_s21 = scalar_lea.vmem %s2134_s16, 256  ;;  %p2136_p0 = scmp.lt.s32.totalorder %s2551_s8, %s2134_s16 }
0x1780   : > { %p2137_p1 = scmp.lt.s32.totalorder %s2135_s21, %s2129_s19 }
0x1782   : > { %p2138_p2 = por %p2137_p1, %p2136_p0 }
0x1784   : > { %p2139_p3 = pnand %p2138_p2, %p2132_p13 }
0x1786   : > { %2142 = shalt.err (!%p2139_p3)
}
0x1787   : > { %s2143_s22 = scalar_lea.hbm %s2549_s17, 128  ;;  %s2147_s9 = scalar_lea.hbm %s2637_s7, 256 }
0x1788   : > { %p2144_p4 = scmp.ne.s32.totalorder %s2549_s17, %s2143_s22  ;;  %p2148_p9 = scmp.lt.s32.totalorder %s2549_s17, %s2637_s7 }
0x1789   : > { %p2149_p10 = scmp.lt.s32.totalorder %s2147_s9, %s2143_s22 }
0x178a   : > { %p2145_p7 = pnand %p2144_p4, %p2310_p5 }
0x178b   : > { %p2150_p11 = por %p2149_p10, %p2148_p9 }
0x178c   : > { %p2146_p8 = pneg %p2145_p7 }
0x178e   : > { %p2151_p12 = pnand %p2150_p11, %p2146_p8 }
0x1790   : > { %2154 = shalt.err (!%p2151_p12)
}
0x1791   : > { %s2228_s19 = smov 4   ;;  %s1786_s16 = sshll.u32 %s2533_s15, 4 }
0x1792   : > { %1983 = dma.vmem_to_hbm [thread:$0]  (%p2310_p5), %s2551_s8, 128, %s2549_s17, %s1659_s18, %s2224_s14, %s2224_s14, %s2228_s19  }
0x1793   : > { %s1854_s21 = sshll.u32 %s2293_s28, 8  ;;  %s276_s22 = scalar_lea.vmem [#allocation6], %s1786_s16 }
0x1794   : > { %s1672_s23 = sshll.u32 %s276_s22, 4  ;;  %s2584_s8 = scalar_lea.hbm %s2636_s6, %s1854_s21  ;;  %s2586_s23 = int_to_ptr.vmem [resolvable:$true] %s1672_s23 }
0x1795   : > { %s1654_s28 = scalar_lea.sflag [#allocation7], %s2533_s15  ;;  %s2155_s17 = scalar_lea.vmem %s2586_s23, 256 }
0x1796   : > { %p2156_p13 = scmp.ne.s32.totalorder %s2586_s23, %s2155_s17  ;;  %s2229_s18 = smov [#allocation6]  }
0x1797   : > { %s2159_s9 = sshll.u32 %s2229_s18, 4  ;;  %s2160_s9 = int_to_ptr.vmem [resolvable:$false] %s2159_s9 }
0x1798   : > { %p2157_p0 = pnand %p2156_p13, %p2310_p5  ;;  %s2161_s13 = scalar_lea.vmem %s2160_s9, 512 }
0x1799   : > { %p2162_p2 = scmp.lt.s32.totalorder %s2586_s23, %s2160_s9  ;;  %p2163_p3 = scmp.lt.s32.totalorder %s2161_s13, %s2155_s17 }
0x179a   : > { %p2158_p1 = pneg %p2157_p0 }
0x179b   : > { %p2164_p4 = por %p2163_p3, %p2162_p2 }
0x179d   : > { %p2165_p7 = pnand %p2164_p4, %p2158_p1 }
0x17f0   : > { %v1645_v6 = vpop.xlane.xlu1 %1644 }
0x17f1   : > { %v1516_v54 = vpop.xlane.xlu0 %1515  ;;  %2125 = vlog2.f32 %v1645_v6 }
0x17f2   : > { %2127 = vlog2.f32 %v1516_v54 }
0x17f5   : > { %v1377_v55 = vpop.permute.xlu0 %1376 }
0x17f6   : > { %1379 = vst.msk [vmem:[#allocation5] sm:$0x3] %vm545_vm2, %v1377_v55 }
0x17fe   : > { %v2126_v56 = vpop.eup %2125 }
0x17ff   : > { %v2128_v57 = vpop.eup %2127  ;;  %v1647_v58 = vmul.f32 0.6931472, %v2126_v56 }
0x1800   : > { %v1518_v59 = vmul.f32 0.6931472, %v2128_v57 }
0x1801   : > { %v1648_v60 = vsub.f32 %v1640_v46, %v1647_v58 }
0x1802   : > { %v1519_v61 = vsub.f32 %v1511_v47, %v1518_v59 }
0x1803   : > { %1649 = vst.msk [vmem:[%s276_s22 + $0x8] sm:$0xff] %vm1507_vm11, %v1648_v60 }
0x1804   : > { %1520 = vst.msk [vmem:[%s276_s22] sm:$0xff] %vm1507_vm11, %v1519_v61 }
0x1805   : > { %2168 = shalt.err (!%p2165_p7)
}
0x1806   : > { %s2169_s20 = scalar_lea.hbm %s2584_s8, 256  ;;  %s2173_s21 = scalar_lea.hbm %s2636_s6, 512 }
0x1807   : > { %p2170_p8 = scmp.ne.s32.totalorder %s2584_s8, %s2169_s20  ;;  %p2174_p11 = scmp.lt.s32.totalorder %s2584_s8, %s2636_s6 }
0x1808   : > { %p2175_p12 = scmp.lt.s32.totalorder %s2173_s21, %s2169_s20 }
0x1809   : > { %p2171_p9 = pnand %p2170_p8, %p2310_p5 }
0x180a   : > { %p2176_p13 = por %p2175_p12, %p2174_p11 }
0x180b   : > { %p2172_p10 = pneg %p2171_p9 }
0x180d   : > { %p2177_p0 = pnand %p2176_p13, %p2172_p10 }
0x180f   : > { %2180 = shalt.err (!%p2177_p0)
}
0x1810   : > { %s2230_s14 = smov 128   ;;  %s2231_s17 = smov 8  }
0x1811   : > { %1982 = dma.vmem_to_hbm [thread:$0]  (%p2310_p5), %s2586_s23, 256, %s2584_s8, %s1654_s28, %s2230_s14, %s2230_s14, %s2231_s17  }
0x1812 PF: > { %p1993_p1 = scmp.ge.s32.totalorder %s2219_s27, 2  ;;  %s1703_s18 = sand.u32 1, %s2207_s24  }
0x1813   : > { %s1704_s9 = scalar_lea.sflag [#allocation7], %s1703_s18 }
0x1814   : > { %p1987_p2 = pnand %p1993_p1, %p2314_p6 }
0x1816   : > { %p1988_p3 = pneg %p1987_p2 }
0x1818   : > { %2198 = dma.done.wait (%p1988_p3), %s1704_s9, 256  }
0x1819   : > { %2200 = vsyncadd (%p1988_p3), %s1704_s9, 4294967040  ;;  %s1713_s13 = scalar_lea.sflag [#allocation9], %s1703_s18 }
0x181a   : > { %2202 = dma.done.wait (%p1988_p3), %s1713_s13, 128  }
0x181b   : > { %2204 = vsyncadd (%p1988_p3), %s1713_s13, 4294967168  ;;  %p21_p5 = scmp.ge.s32.totalorder %s2297_s30, 4   ;;  %s2640_s24 = smov %s2211_s25 }
0x181c   : > { %s2641_s25 = smov %s2215_s26  ;;  %s2642_s26 = smov %s2308_s10 }
0x181d   : > { %s2643_s27 = smov %s2297_s30  ;;  %23 = sbr.rel (!%p21_p5) target bundleno = 5 (0x5), region = 112 }
0x1822   :  { %1718 = vsyncpa [#allocation7], 1 }
0x1823   :  { %1720 = vsyncpa [#allocation7 + $0x1], 1 }
0x1824   :  { %1721 = vsyncpa [#allocation9], 1 }
0x1825   :  { %1723 = vsyncpa [#allocation9 + $0x1], 1 }

</bundles_post_ra>
